<compile_context>
chip_gen: v7x
topology: tpu7x:2x2x1
jax: 0.10.0
libtpu: 0.0.40
codegen_flags: <defaults>
</compile_context>

<pallas_src>
import functools

import jax
import jax.numpy as jnp
from jax.experimental import pallas as pl
from jax.experimental.pallas import tpu as pltpu

BN_EPS = 1e-5
ACT_DTYPE = jnp.bfloat16          # inter-layer activation dtype


def _round_up(x, m):
    return (x + m - 1) // m * m


def _largest_tile(padded, unit, cap):
    """Largest multiple of `unit` <= cap that divides `padded`."""
    if padded <= cap:
        return padded
    for mult in range(cap // unit, 0, -1):
        t = mult * unit
        if padded % t == 0:
            return t
    return unit


def _spatial_tile(hw, cap=2048):
    """Divisor-based spatial tile; 0 means 'use the padded-grid fallback'."""
    if hw <= cap:
        return hw
    for t in range(cap, 7, -1):
        if hw % t == 0 and t % 8 == 0:
            return t
    return 0


def _row_tile(h, cap=64):
    if h <= cap:
        return h
    for t in range(cap, 0, -1):
        if h % t == 0:
            return t
    return h


# ---------------------------------------------------------------------------
# Pallas kernels: matmul + folded BN (+residual) epilogue
# ---------------------------------------------------------------------------
def _mm_affine_1k_kernel(a_ref, b_ref, s_ref, c_ref, o_ref, *, relu):
    """Single-K-step: out = act((a @ b) * scale + bias)."""
    y = jnp.dot(a_ref[...], b_ref[...], preferred_element_type=jnp.float32)
    y = y * s_ref[...] + c_ref[...]
    if relu:
        y = jnp.maximum(y, 0.0)
    o_ref[...] = y.astype(o_ref.dtype)


def _mm_affine_1k_res_kernel(a_ref, b_ref, s_ref, c_ref, r_ref, o_ref, *, relu):
    """Single-K-step with fused residual add."""
    y = jnp.dot(a_ref[...], b_ref[...], preferred_element_type=jnp.float32)
    y = y * s_ref[...] + c_ref[...] + r_ref[...].astype(jnp.float32)
    if relu:
        y = jnp.maximum(y, 0.0)
    o_ref[...] = y.astype(o_ref.dtype)


def _mm_affine_kernel(a_ref, b_ref, s_ref, c_ref, o_ref, acc_ref, *, relu):
    """Multi-K-step fallback with f32 VMEM accumulator."""
    @pl.when(pl.program_id(2) == 0)
    def _():
        acc_ref[...] = jnp.zeros_like(acc_ref)

    acc_ref[...] += jnp.dot(a_ref[...], b_ref[...],
                            preferred_element_type=jnp.float32)

    @pl.when(pl.program_id(2) == pl.num_programs(2) - 1)
    def _():
        y = acc_ref[...] * s_ref[...] + c_ref[...]
        if relu:
            y = jnp.maximum(y, 0.0)
        o_ref[...] = y.astype(o_ref.dtype)


def _mm_affine_res_kernel(a_ref, b_ref, s_ref, c_ref, r_ref, o_ref, acc_ref,
                          *, relu):
    @pl.when(pl.program_id(2) == 0)
    def _():
        acc_ref[...] = jnp.zeros_like(acc_ref)

    acc_ref[...] += jnp.dot(a_ref[...], b_ref[...],
                            preferred_element_type=jnp.float32)

    @pl.when(pl.program_id(2) == pl.num_programs(2) - 1)
    def _():
        y = acc_ref[...] * s_ref[...] + c_ref[...] + r_ref[...].astype(jnp.float32)
        if relu:
            y = jnp.maximum(y, 0.0)
        o_ref[...] = y.astype(o_ref.dtype)


@functools.partial(jax.jit, static_argnames=("relu", "out_dtype"))
def matmul_affine(a, b, scale=None, bias=None, residual=None, *, relu=False,
                  out_dtype=ACT_DTYPE):
    """(M,K) @ (K,N) with per-output-channel affine (+residual) epilogue."""
    M, K = a.shape
    K2, N = b.shape
    assert K == K2
    if scale is None:
        scale = jnp.ones((N,), jnp.float32)
    if bias is None:
        bias = jnp.zeros((N,), jnp.float32)

    # ---- tile selection: big tm tiles, no gratuitous 128 padding ----
    tm = min(512, _round_up(M, 8))
    Mp = _round_up(M, tm)
    if N <= 256:
        Np, tn = N, N
    else:
        Np = _round_up(N, 128)
        tn = _largest_tile(Np, 128, 256)
    if K <= 2048:
        Kp = K if K % 8 == 0 else _round_up(K, 128)
        tk = Kp
    else:
        Kp = _round_up(K, 128)
        tk = _largest_tile(Kp, 128, 512)
    single_k = (tk == Kp)

    a_p = a.astype(jnp.bfloat16)
    if (Mp, Kp) != (M, K):
        a_p = jnp.pad(a_p, ((0, Mp - M), (0, Kp - K)))
    b_p = b.astype(jnp.bfloat16)
    if (Kp, Np) != (K, N):
        b_p = jnp.pad(b_p, ((0, Kp - K), (0, Np - N)))
    s_p = scale.astype(jnp.float32)
    c_p = bias.astype(jnp.float32)
    if Np != N:
        s_p = jnp.pad(s_p, (0, Np - N))
        c_p = jnp.pad(c_p, (0, Np - N))
    s_p = s_p.reshape(1, Np)
    c_p = c_p.reshape(1, Np)

    r_p = None
    if residual is not None:
        r_p = residual.astype(jnp.bfloat16)
        if (Mp, Np) != (M, N):
            r_p = jnp.pad(r_p, ((0, Mp - M), (0, Np - N)))

    if single_k:
        in_specs = [
            pl.BlockSpec((tm, Kp), lambda i, j: (i, 0)),
            pl.BlockSpec((Kp, tn), lambda i, j: (0, j)),
            pl.BlockSpec((1, tn), lambda i, j: (0, j)),
            pl.BlockSpec((1, tn), lambda i, j: (0, j)),
        ]
        if residual is None:
            kernel = functools.partial(_mm_affine_1k_kernel, relu=relu)
            args = (a_p, b_p, s_p, c_p)
        else:
            kernel = functools.partial(_mm_affine_1k_res_kernel, relu=relu)
            in_specs.append(pl.BlockSpec((tm, tn), lambda i, j: (i, j)))
            args = (a_p, b_p, s_p, c_p, r_p)
        out = pl.pallas_call(
            kernel,
            out_shape=jax.ShapeDtypeStruct((Mp, Np), out_dtype),
            grid_spec=pltpu.PrefetchScalarGridSpec(
                num_scalar_prefetch=0,
                grid=(Mp // tm, Np // tn),
                in_specs=in_specs,
                out_specs=pl.BlockSpec((tm, tn), lambda i, j: (i, j)),
            ),
            compiler_params=pltpu.CompilerParams(
                dimension_semantics=("parallel", "parallel")),
        )(*args)
    else:
        in_specs = [
            pl.BlockSpec((tm, tk), lambda i, j, k: (i, k)),
            pl.BlockSpec((tk, tn), lambda i, j, k: (k, j)),
            pl.BlockSpec((1, tn), lambda i, j, k: (0, j)),
            pl.BlockSpec((1, tn), lambda i, j, k: (0, j)),
        ]
        if residual is None:
            kernel = functools.partial(_mm_affine_kernel, relu=relu)
            args = (a_p, b_p, s_p, c_p)
        else:
            kernel = functools.partial(_mm_affine_res_kernel, relu=relu)
            in_specs.append(pl.BlockSpec((tm, tn), lambda i, j, k: (i, j)))
            args = (a_p, b_p, s_p, c_p, r_p)
        out = pl.pallas_call(
            kernel,
            out_shape=jax.ShapeDtypeStruct((Mp, Np), out_dtype),
            grid_spec=pltpu.PrefetchScalarGridSpec(
                num_scalar_prefetch=0,
                grid=(Mp // tm, Np // tn, Kp // tk),
                in_specs=in_specs,
                out_specs=pl.BlockSpec((tm, tn), lambda i, j, k: (i, j)),
                scratch_shapes=[pltpu.VMEM((tm, tn), jnp.float32)],
            ),
            compiler_params=pltpu.CompilerParams(
                dimension_semantics=("parallel", "parallel", "arbitrary")),
        )(*args)

    if (Mp, Np) != (M, N):
        out = out[:M, :N]
    return out


# ---------------------------------------------------------------------------
# 3x3 / stride-1 / pad-1 conv + folded BN + optional ReLU
# ---------------------------------------------------------------------------
def _conv3x3_kernel(x_ref, w_ref, s_ref, b_ref, ml_ref, mr_ref, o_ref,
                    *, W, rows, relu, tiled):
    """9 taps as contiguous row-shifted matmuls on a row-flattened,
    H-only-padded image; left/right edge taps are masked out."""
    base = pl.program_id(1) * rows if tiled else 0
    acc = None
    for dj in range(3):
        part = None
        for di in range(3):
            off = (di + 1) * W + (dj - 1)
            a = x_ref[0, pl.ds(base + off, rows), :]
            d = jnp.dot(a, w_ref[di * 3 + dj],
                        preferred_element_type=jnp.float32)
            part = d if part is None else part + d
        if dj == 0:
            part = part * ml_ref[...]
        elif dj == 2:
            part = part * mr_ref[...]
        acc = part if acc is None else acc + part
    y = acc * s_ref[...] + b_ref[...]
    if relu:
        y = jnp.maximum(y, 0.0)
    o_ref[0] = y.astype(o_ref.dtype)


@functools.partial(jax.jit, static_argnames=("relu",))
def conv3x3_bn_act(x, w, scale, bias, *, relu=True):
    """3x3 / stride-1 / pad-1 conv + folded BN + optional ReLU.

    Only the H axis is zero-padded (2 rows top/bottom); the horizontal edge
    taps wrap to the neighbouring row and are zeroed with per-column masks,
    so the kernel writes W-wide rows directly (no column-drop pass)."""
    N, H, W, C = x.shape
    cout = w.shape[-1]
    Tr = _row_tile(H)
    nrt = H // Tr
    rows = Tr * W

    xpad = jnp.pad(x.astype(ACT_DTYPE), ((0, 0), (2, 2), (0, 0), (0, 0)))
    R = (H + 4) * W
    xflat = xpad.reshape(N, R, C)
    w9 = w.reshape(9, C, cout)                      # already bf16
    s = scale.astype(jnp.float32).reshape(1, cout)
    b = bias.astype(jnp.float32).reshape(1, cout)

    col = jnp.arange(H * W, dtype=jnp.int32) % W
    mask_l = (col != 0).astype(jnp.float32).reshape(H * W, 1)
    mask_r = (col != W - 1).astype(jnp.float32).reshape(H * W, 1)

    out = pl.pallas_call(
        functools.partial(_conv3x3_kernel, W=W, rows=rows, relu=relu,
                          tiled=(nrt > 1)),
        out_shape=jax.ShapeDtypeStruct((N, H * W, cout), ACT_DTYPE),
        grid=(N, nrt),
        in_specs=[
            pl.BlockSpec((1, R, C), lambda n, t: (n, 0, 0)),
            pl.BlockSpec((9, C, cout), lambda n, t: (0, 0, 0)),
            pl.BlockSpec((1, cout), lambda n, t: (0, 0)),
            pl.BlockSpec((1, cout), lambda n, t: (0, 0)),
            pl.BlockSpec((rows, 1), lambda n, t: (t, 0)),
            pl.BlockSpec((rows, 1), lambda n, t: (t, 0)),
        ],
        out_specs=pl.BlockSpec((1, rows, cout), lambda n, t: (n, t, 0)),
        compiler_params=pltpu.CompilerParams(
            dimension_semantics=("parallel", "parallel")),
    )(xflat, w9, s, b, mask_l, mask_r)
    return out.reshape(N, H, W, cout)


# ---------------------------------------------------------------------------
# SE scale + residual + ReLU (elementwise)
# ---------------------------------------------------------------------------
def _scale_add_relu_kernel(x_ref, s_ref, r_ref, o_ref):
    y = x_ref[...].astype(jnp.float32) * s_ref[...] \
        + r_ref[...].astype(jnp.float32)
    o_ref[...] = jnp.maximum(y, 0.0).astype(o_ref.dtype)


@jax.jit
def se_scale_add_relu(x, scale, residual):
    """relu(x * se_scale + residual); x,res: (N,H,W,C) bf16, scale: (N,C) f32."""
    N, H, W, C = x.shape
    HW = H * W
    T = _spatial_tile(HW)
    if T == 0:                       # awkward HW: pad to a multiple of 1024
        T = 1024
        HWp = _round_up(HW, T)
    else:
        HWp = HW
    xr = x.reshape(N, HW, C)
    rr = residual.reshape(N, HW, C)
    if HWp != HW:
        xr = jnp.pad(xr, ((0, 0), (0, HWp - HW), (0, 0)))
        rr = jnp.pad(rr, ((0, 0), (0, HWp - HW), (0, 0)))
    sr = scale.reshape(N, 1, C)
    out = pl.pallas_call(
        _scale_add_relu_kernel,
        out_shape=jax.ShapeDtypeStruct((N, HWp, C), ACT_DTYPE),
        grid=(N, HWp // T),
        in_specs=[
            pl.BlockSpec((1, T, C), lambda n, t: (n, t, 0)),
            pl.BlockSpec((1, 1, C), lambda n, t: (n, 0, 0)),
            pl.BlockSpec((1, T, C), lambda n, t: (n, t, 0)),
        ],
        out_specs=pl.BlockSpec((1, T, C), lambda n, t: (n, t, 0)),
        compiler_params=pltpu.CompilerParams(
            dimension_semantics=("parallel", "parallel")),
    )(xr, sr, rr)
    if HWp != HW:
        out = out[:, :HW, :]
    return out.reshape(N, H, W, C)


# ---------------------------------------------------------------------------
# Squeeze-Excite: fc1 + ReLU + fc2 + sigmoid in one kernel
# ---------------------------------------------------------------------------
def _se_kernel(x_ref, w1_ref, b1_ref, w2_ref, b2_ref, o_ref):
    x = x_ref[...].astype(jnp.bfloat16)
    h = jnp.dot(x, w1_ref[...], preferred_element_type=jnp.float32) + b1_ref[...]
    h = jnp.maximum(h, 0.0)
    s = jnp.dot(h.astype(jnp.bfloat16), w2_ref[...],
                preferred_element_type=jnp.float32) + b2_ref[...]
    o_ref[...] = 1.0 / (1.0 + jnp.exp(-s))          # sigmoid


@jax.jit
def se_module_scale(x, p):
    """Squeeze-Excite: GAP -> fc1 -> ReLU -> fc2 -> sigmoid."""
    N, H, W, C = x.shape
    # f32 accumulation without materializing an f32 copy of the activation
    pooled = jnp.mean(x, axis=(1, 2), dtype=jnp.float32)            # (N, C)
    cr = p["w1"].shape[-1]
    return pl.pallas_call(
        _se_kernel,
        out_shape=jax.ShapeDtypeStruct((N, C), jnp.float32),
        grid=(1,),
        in_specs=[
            pl.BlockSpec((N, C), lambda i: (0, 0)),
            pl.BlockSpec((C, cr), lambda i: (0, 0)),
            pl.BlockSpec((1, cr), lambda i: (0, 0)),
            pl.BlockSpec((cr, C), lambda i: (0, 0)),
            pl.BlockSpec((1, C), lambda i: (0, 0)),
        ],
        out_specs=pl.BlockSpec((N, C), lambda i: (0, 0)),
    )(pooled, p["w1"], p["b1"].reshape(1, cr), p["w2"], p["b2"].reshape(1, C))


# ---------------------------------------------------------------------------
# BoT multi-head self-attention with fused post-attention BN + ReLU
# ---------------------------------------------------------------------------
def _mhsa_bn_relu_kernel(q_ref, kT_ref, v_ref, bias_ref, s_ref, b_ref, o_ref):
    q = q_ref[0, 0]                  # (L, D) bf16, pre-scaled
    kT = kT_ref[0, 0]                # (D, L) bf16  (pre-transposed; no XLU)
    v = v_ref[0, 0]                  # (L, D) bf16
    sim = jnp.dot(q, kT, preferred_element_type=jnp.float32)
    sim = sim + bias_ref[0, 0].astype(jnp.float32)
    sim = sim - jnp.max(sim, axis=-1, keepdims=True)
    p = jnp.exp(sim)
    attn = p / jnp.sum(p, axis=-1, keepdims=True)
    o = jnp.dot(attn.astype(v.dtype), v, preferred_element_type=jnp.float32)
    o = o * s_ref[0] + b_ref[0]                     # fused BatchNorm2d
    o_ref[0, 0] = jnp.maximum(o, 0.0).astype(o_ref.dtype)


@jax.jit
def mhsa_bn_relu(q, kT, v, bias, bn_scale, bn_bias):
    # TODO(synk): for L >= ~200 this should tile the kv axis flash-style.
    N, heads, L, D = q.shape
    return pl.pallas_call(
        _mhsa_bn_relu_kernel,
        out_shape=jax.ShapeDtypeStruct((N, heads, L, D), ACT_DTYPE),
        grid=(N, heads),
        in_specs=[
            pl.BlockSpec((1, 1, L, D), lambda n, h: (n, h, 0, 0)),
            pl.BlockSpec((1, 1, D, L), lambda n, h: (n, h, 0, 0)),
            pl.BlockSpec((1, 1, L, D), lambda n, h: (n, h, 0, 0)),
            pl.BlockSpec((1, 1, L, L), lambda n, h: (n, h, 0, 0)),
            pl.BlockSpec((1, 1, D), lambda n, h: (h, 0, 0)),
            pl.BlockSpec((1, 1, D), lambda n, h: (h, 0, 0)),
        ],
        out_specs=pl.BlockSpec((1, 1, L, D), lambda n, h: (n, h, 0, 0)),
        compiler_params=pltpu.CompilerParams(
            dimension_semantics=("parallel", "parallel")),
    )(q, kT, v, bias, bn_scale, bn_bias)


# ---------------------------------------------------------------------------
# Conv / pooling glue around the Pallas kernels
# ---------------------------------------------------------------------------
def _im2col(x, k, stride, pad):
    # only used for the 7x7 / 3-channel stem (tiny K); 3x3 convs use the
    # in-kernel tap decomposition above.
    N, H, W, C = x.shape
    xp = jnp.pad(x, ((0, 0), (pad, pad), (pad, pad), (0, 0)))
    Ho = (H + 2 * pad - k) // stride + 1
    Wo = (W + 2 * pad - k) // stride + 1
    cols = []
    for i in range(k):
        for j in range(k):
            cols.append(xp[:, i:i + stride * (Ho - 1) + 1:stride,
                           j:j + stride * (Wo - 1) + 1:stride, :])
    patches = jnp.concatenate(cols, axis=-1).reshape(N * Ho * Wo, k * k * C)
    return patches, Ho, Wo


def conv_bn_act(x, p, *, k, stride=1, pad=0, relu=True):
    """Bias-free conv + folded BatchNorm + optional ReLU."""
    N, H, W, C = x.shape
    if k == 3 and stride == 1 and pad == 1:
        return conv3x3_bn_act(x, p["w"], p["scale"], p["bias"], relu=relu)
    if k == 1:
        xs = x[:, ::stride, ::stride, :] if stride > 1 else x
        Ho, Wo = xs.shape[1], xs.shape[2]
        patches = xs.reshape(N * Ho * Wo, C)
    else:
        patches, Ho, Wo = _im2col(x, k, stride, pad)
    y = matmul_affine(patches, p["w"], p["scale"], p["bias"], relu=relu)
    return y.reshape(N, Ho, Wo, -1)


def max_pool_3x3_s2_ceil(x):
    # nn.MaxPool2d(kernel_size=3, stride=2, ceil_mode=True)
    N, H, W, C = x.shape
    Ho = -(-(H - 3) // 2) + 1
    Wo = -(-(W - 3) // 2) + 1
    ph = max(0, (Ho - 1) * 2 + 3 - H)
    pw = max(0, (Wo - 1) * 2 + 3 - W)
    xp = jnp.pad(x, ((0, 0), (0, ph), (0, pw), (0, 0)),
                 constant_values=-jnp.inf)
    out = None
    for i in range(3):
        for j in range(3):
            s = xp[:, i:i + 2 * (Ho - 1) + 1:2, j:j + 2 * (Wo - 1) + 1:2, :]
            out = s if out is None else jnp.maximum(out, s)
    return out


# ---------------------------------------------------------------------------
# SE-ResNet blocks
# ---------------------------------------------------------------------------
def se_bottleneck(x, p):
    stride = p["stride"]
    out = conv_bn_act(x, p["conv1"], k=1, stride=stride, relu=True)
    out = conv_bn_act(out, p["conv2"], k=3, stride=1, pad=1, relu=True)
    out = conv_bn_act(out, p["conv3"], k=1, stride=1, relu=False)
    residual = (conv_bn_act(x, p["downsample"], k=1, stride=stride, relu=False)
                if "downsample" in p else x)
    scale = se_module_scale(out, p["se"])     # depends on conv3 output
    return se_scale_add_relu(out, scale, residual)


# ---------------------------------------------------------------------------
# BoT BottleBlock (lucidrains) with relative position embeddings
# ---------------------------------------------------------------------------
def _rel_to_abs(x):
    b, h, l, _ = x.shape
    x = jnp.pad(x, ((0, 0), (0, 0), (0, 0), (0, 1)))
    x = x.reshape(b, h, l * 2 * l)
    x = jnp.pad(x, ((0, 0), (0, 0), (0, l - 1)))
    x = x.reshape(b, h, l + 1, 2 * l - 1)
    return x[:, :, :l, l - 1:]


def _relative_logits_1d(q, rel_k):
    # q: (B, heads, X, Y, d), rel_k: (2Y-1, d) -> (B, heads, X, X, Y, Y)
    B, heads, X, Y, d = q.shape
    logits = jnp.einsum('bhxyd,rd->bhxyr', q, rel_k.astype(q.dtype))
    logits = logits.reshape(B, heads * X, Y, 2 * Y - 1)
    logits = _rel_to_abs(logits)
    logits = logits.reshape(B, heads, X, Y, Y)
    return jnp.broadcast_to(logits[:, :, :, None, :, :],
                            (B, heads, X, X, Y, Y))      # 'b h x i y j'


def _rel_pos_bias(q, rel_h, rel_w, H, W):
    # q: (N, heads, H*W, d) f32, already scaled.
    N, heads, HW, d = q.shape
    q5 = q.reshape(N, heads, H, W, d)
    lw = _relative_logits_1d(q5, rel_w)
    lw = jnp.transpose(lw, (0, 1, 2, 4, 3, 5)).reshape(N, heads, H * W, H * W)
    q5t = jnp.transpose(q5, (0, 1, 3, 2, 4))
    lh = _relative_logits_1d(q5t, rel_h)
    lh = jnp.transpose(lh, (0, 1, 4, 2, 5, 3)).reshape(N, heads, H * W, H * W)
    return lw + lh


def bot_attention_bn_relu(x, p):
    """BoT MHSA with rel-pos bias; the following BN+ReLU is fused in-kernel."""
    N, H, W, C = x.shape
    heads, dim_head = p["heads"], p["dim_head"]
    inner = heads * dim_head
    qkv = matmul_affine(x.reshape(N * H * W, C), p["w_qkv"], relu=False)
    qkv = qkv.reshape(N, H * W, 3, heads, dim_head)
    q = jnp.transpose(qkv[:, :, 0], (0, 2, 1, 3)).astype(jnp.float32)   # (N,h,L,D)
    kT = jnp.transpose(qkv[:, :, 1], (0, 2, 3, 1))                      # (N,h,D,L)
    v = jnp.transpose(qkv[:, :, 2], (0, 2, 1, 3))                       # (N,h,L,D)
    q = q * (dim_head ** -0.5)
    bias = _rel_pos_bias(q, p["rel_h"], p["rel_w"], H, W).astype(ACT_DTYPE)
    bn_s = p["bn_mid_scale"].reshape(heads, 1, dim_head)
    bn_b = p["bn_mid_bias"].reshape(heads, 1, dim_head)
    o = mhsa_bn_relu(q.astype(ACT_DTYPE), kT, v, bias, bn_s, bn_b)
    return jnp.transpose(o, (0, 2, 1, 3)).reshape(N, H, W, inner)


def bottle_block(x, p):
    N, H, W, C = x.shape
    shortcut = x                         # dim == dim_out, no downsample
    h = conv_bn_act(x, p["conv_in"], k=1, relu=True)        # 2048 -> 512
    h = bot_attention_bn_relu(h, p)                         # -> 1024 (+BN+ReLU)
    inner = h.shape[-1]
    y = matmul_affine(h.reshape(N * H * W, inner), p["conv_out"]["w"],
                      p["conv_out"]["scale"], p["conv_out"]["bias"],
                      residual=shortcut.reshape(N * H * W, C), relu=True)
    return y.reshape(N, H, W, C)


# ---------------------------------------------------------------------------
# Deterministic synthetic parameter initialisation (weights stored in bf16)
# ---------------------------------------------------------------------------
def init_conv_bn(key, cin, cout, k, zero_gamma=False):
    kw, kg, kb = jax.random.split(key, 3)
    fan_in = cin * k * k
    w = (jax.random.normal(kw, (k * k * cin, cout), jnp.float32)
         * (2.0 / fan_in) ** 0.5).astype(jnp.bfloat16)
    if zero_gamma:
        gamma = jnp.zeros((cout,), jnp.float32)
        beta = jnp.zeros((cout,), jnp.float32)
    else:
        gamma = 1.0 + 0.1 * jax.random.normal(kg, (cout,), jnp.float32)
        beta = 0.1 * jax.random.normal(kb, (cout,), jnp.float32)
    scale = gamma / jnp.sqrt(1.0 + BN_EPS)     # BN folded (mean=0, var=1)
    return {"w": w, "scale": scale, "bias": beta}


def init_se(key, c, reduction=16):
    cr = c // reduction
    k1, k2 = jax.random.split(key)
    return {
        "w1": (jax.random.normal(k1, (c, cr), jnp.float32)
               * (1.0 / c) ** 0.5).astype(jnp.bfloat16),
        "b1": jnp.zeros((cr,), jnp.float32),
        "w2": (jax.random.normal(k2, (cr, c), jnp.float32)
               * (1.0 / cr) ** 0.5).astype(jnp.bfloat16),
        "b2": jnp.zeros((c,), jnp.float32),
    }


def init_se_bottleneck(key, inplanes, planes, stride, downsample):
    ks = jax.random.split(key, 5)
    p = {
        "stride": stride,
        "conv1": init_conv_bn(ks[0], inplanes, planes, 1),
        "conv2": init_conv_bn(ks[1], planes, planes, 3),
        "conv3": init_conv_bn(ks[2], planes, planes * 4, 1),
        "se": init_se(ks[3], planes * 4),
    }
    if downsample:
        p["downsample"] = init_conv_bn(ks[4], inplanes, planes * 4, 1)
    return p


def init_layer(key, inplanes, planes, blocks, stride):
    ps = []
    for i in range(blocks):
        bk = jax.random.fold_in(key, i)
        s = stride if i == 0 else 1
        inp = inplanes if i == 0 else planes * 4
        ds = (i == 0) and (stride != 1 or inplanes != planes * 4)
        ps.append(init_se_bottleneck(bk, inp, planes, s, ds))
    return ps


def init_bottle_block(key, fmap_size, dim=2048, dim_out=2048, proj_factor=4,
                      heads=8, dim_head=128):
    attn_dim_in = dim_out // proj_factor        # 512
    attn_dim_out = heads * dim_head             # 1024
    ks = jax.random.split(key, 6)
    pos_scale = dim_head ** -0.5
    fh, fw = fmap_size
    gamma = 1.0 + 0.1 * jax.random.normal(ks[4], (attn_dim_out,), jnp.float32)
    return {
        "heads": heads,
        "dim_head": dim_head,
        "conv_in": init_conv_bn(ks[0], dim, attn_dim_in, 1),
        "w_qkv": (jax.random.normal(ks[1], (attn_dim_in, attn_dim_out * 3),
                                    jnp.float32)
                  * (1.0 / attn_dim_in) ** 0.5).astype(jnp.bfloat16),
        "rel_h": jax.random.normal(ks[2], (2 * fh - 1, dim_head),
                                   jnp.float32) * pos_scale,
        "rel_w": jax.random.normal(ks[3], (2 * fw - 1, dim_head),
                                   jnp.float32) * pos_scale,
        "bn_mid_scale": gamma / jnp.sqrt(1.0 + BN_EPS),
        "bn_mid_bias": jnp.zeros((attn_dim_out,), jnp.float32),
        "conv_out": init_conv_bn(ks[5], attn_dim_out, dim_out, 1,
                                 zero_gamma=True),
    }


def init_botser50(key, fmap_size):
    ks = jax.random.split(key, 6)
    return {
        "stem": init_conv_bn(ks[0], 3, 64, 7),            # 7x7 s2 conv + BN + ReLU
        "layer1": init_layer(ks[1], 64, 64, 3, 1),
        "layer2": init_layer(ks[2], 256, 128, 4, 2),
        "layer3": init_layer(ks[3], 512, 256, 6, 2),
        "layer4_res": init_layer(ks[4], 1024, 512, 2, 2),  # children[:2] of layer4
        "bot": init_bottle_block(ks[5], fmap_size),
    }


# ---------------------------------------------------------------------------
# Encoder forward: returns [x, layer0, layer1, layer2, layer3, layer4]
# ---------------------------------------------------------------------------
def botser50_forward(params, x_nchw):
    x = jnp.transpose(x_nchw, (0, 2, 3, 1)).astype(jnp.float32)   # NCHW -> NHWC
    feats = [x]                                                    # layerinit = Identity
    x0 = conv_bn_act(x, params["stem"], k=7, stride=2, pad=3, relu=True)
    feats.append(x0)                                               # layer0 output (pre-pool)
    x = max_pool_3x3_s2_ceil(x0)                                   # pool after recording
    for name in ("layer1", "layer2", "layer3"):
        for bp in params[name]:
            x = se_bottleneck(x, bp)
        feats.append(x)
    for bp in params["layer4_res"]:
        x = se_bottleneck(x, bp)
    x = bottle_block(x, params["bot"])
    feats.append(x)
    return [jnp.transpose(f, (0, 3, 1, 2)).astype(jnp.float32) for f in feats]


if __name__ == "__main__":
    key = jax.random.PRNGKey(0)
    pkey, xkey = jax.random.split(key)
    N, H, W = 2, 64, 64                   # layer4 feature map = (H//32, W//32) = 2x2
    params = init_botser50(pkey, fmap_size=(H // 32, W // 32))
    x = jax.random.normal(xkey, (N, 3, H, W), dtype=jnp.float32)

    fwd = jax.jit(lambda inp: botser50_forward(params, inp))
    feats = jax.block_until_ready(fwd(x))

    expected = [(N, 3, 64, 64), (N, 64, 32, 32), (N, 256, 16, 16),
                (N, 512, 8, 8), (N, 1024, 4, 4), (N, 2048, 2, 2)]
    assert [tuple(map(int, f.shape)) for f in feats] == expected, \
        [tuple(f.shape) for f in feats]
    assert all(bool(jnp.all(jnp.isfinite(f))) for f in feats)
    print("KERNEL_OK")
</pallas_src>

<mosaic_0001>
module attributes {stable_mosaic.version = 11 : i64} {
  func.func @_mm_affine_1k_kernel(%arg0: i32, %arg1: i32, %arg2: memref<512x256xbf16, #tpu.memory_space<vmem>>, %arg3: memref<256x64xbf16, #tpu.memory_space<vmem>>, %arg4: memref<1x64xf32, #tpu.memory_space<vmem>>, %arg5: memref<1x64xf32, #tpu.memory_space<vmem>>, %arg6: memref<512x64xbf16, #tpu.memory_space<vmem>>) attributes {dimension_semantics = [#tpu.dimension_semantics<parallel>, #tpu.dimension_semantics<parallel>], iteration_bounds = array<i64: 4, 1>, scalar_prefetch = 0 : i64, scratch_operands = 0 : i64, tpu.core_type = #tpu.core_type<tc>, window_params = [{transform_indices = @transform_0, window_bounds = array<i64: 512, 256>}, {transform_indices = @transform_1, window_bounds = array<i64: 256, 64>}, {transform_indices = @transform_2, window_bounds = array<i64: 1, 64>}, {transform_indices = @transform_3, window_bounds = array<i64: 1, 64>}, {transform_indices = @transform_4, window_bounds = array<i64: 512, 64>}]} {
    %c0 = arith.constant 0 : index
    %c0_0 = arith.constant 0 : index
    %0 = vector.load %arg2[%c0, %c0_0] : memref<512x256xbf16, #tpu.memory_space<vmem>>, vector<512x256xbf16>
    %c0_1 = arith.constant 0 : index
    %c0_2 = arith.constant 0 : index
    %1 = vector.load %arg3[%c0_1, %c0_2] : memref<256x64xbf16, #tpu.memory_space<vmem>>, vector<256x64xbf16>
    %cst = arith.constant dense<0.000000e+00> : vector<512x64xf32>
    %2 = tpu.matmul %0, %1, %cst {dimension_numbers = #tpu.dot_dimension_numbers<[1], [0], [0], [1], [0, 0, 1, 1], [], []>} : vector<512x256xbf16>, vector<256x64xbf16>, vector<512x64xf32> -> vector<512x64xf32>
    %c0_3 = arith.constant 0 : index
    %c0_4 = arith.constant 0 : index
    %3 = vector.load %arg4[%c0_3, %c0_4] : memref<1x64xf32, #tpu.memory_space<vmem>>, vector<1x64xf32>
    %4 = vector.broadcast %3 : vector<1x64xf32> to vector<512x64xf32>
    %5 = arith.mulf %2, %4 : vector<512x64xf32>
    %c0_5 = arith.constant 0 : index
    %c0_6 = arith.constant 0 : index
    %6 = vector.load %arg5[%c0_5, %c0_6] : memref<1x64xf32, #tpu.memory_space<vmem>>, vector<1x64xf32>
    %7 = vector.broadcast %6 : vector<1x64xf32> to vector<512x64xf32>
    %8 = arith.addf %5, %7 : vector<512x64xf32>
    %cst_7 = arith.constant 0.000000e+00 : f32
    %9 = vector.broadcast %cst_7 : f32 to vector<512x64xf32>
    %10 = arith.maximumf %8, %9 : vector<512x64xf32>
    %11 = arith.truncf %10 : vector<512x64xf32> to vector<512x64xbf16>
    %c0_8 = arith.constant 0 : index
    %c0_9 = arith.constant 0 : index
    %12 = vector.load %arg6[%c0_8, %c0_9] : memref<512x64xbf16, #tpu.memory_space<vmem>>, vector<512x64xbf16>
    tpu.vector_store %arg6[%c0_8, %c0_9], %11 {strides = array<i32>} : memref<512x64xbf16, #tpu.memory_space<vmem>>, vector<512x64xbf16>,
    return
  }
  func.func @transform_0(%arg0: i32, %arg1: i32) -> (i32, i32) {
    %c0_i32 = arith.constant 0 : i32
    %c0_i32_0 = arith.constant 0 : i32
    return %arg0, %c0_i32 : i32, i32
  }
  func.func @transform_1(%arg0: i32, %arg1: i32) -> (i32, i32) {
    %c0_i32 = arith.constant 0 : i32
    %c0_i32_0 = arith.constant 0 : i32
    return %c0_i32, %arg1 : i32, i32
  }
  func.func @transform_2(%arg0: i32, %arg1: i32) -> (i32, i32) {
    %c0_i32 = arith.constant 0 : i32
    %c0_i32_0 = arith.constant 0 : i32
    return %c0_i32, %arg1 : i32, i32
  }
  func.func @transform_3(%arg0: i32, %arg1: i32) -> (i32, i32) {
    %c0_i32 = arith.constant 0 : i32
    %c0_i32_0 = arith.constant 0 : i32
    return %c0_i32, %arg1 : i32, i32
  }
  func.func @transform_4(%arg0: i32, %arg1: i32) -> (i32, i32) {
    %c0_i32 = arith.constant 0 : i32
    return %arg0, %arg1 : i32, i32
  }
}

</mosaic_0001>

<bundles_post_ra>
// kernel: matmul_affine.1
= control target key start
LH: loop header
LB: loop body
LE: loop exit
PB: predicated region body
PF: predicated region fallthrough
CT: control target
= control target key end

     0   :  { %s2157_s15 = smov 0   ;;  %s2159_s16 = smov 0   ;;  %s2608_s0 = inlined_call_operand.vmem [shape: bf16[2048,256], index: 0, kind: input, shape index: {}]   ;;  %s2609_s1 = inlined_call_operand.vmem [shape: bf16[256,64], index: 1, kind: input, shape index: {}]   ;;  %s2610_s2 = inlined_call_operand.vmem [shape: f32[1,64], index: 2, kind: input, shape index: {}]   ;;  %s2611_s3 = inlined_call_operand.vmem [shape: f32[1,64], index: 3, kind: input, shape index: {}]   ;;  %s2612_s4 = inlined_call_operand.vmem [shape: bf16[2048,64], index: 4, kind: output, shape index: {}]  }
   0x1   :  { %s2161_s17 = smov 0  }
   0x2 LB: > { %s26_s18 = sadd.s32 1, %s2125_s16  ;;  %p1719_p0 = scmp.ge.s32.totalorder %s2129_s17, 1  ;;  %s2129_s17 = sphi %s2161_s17, %s14_s17   ;;  %s2125_s16 = sphi %s2159_s16, %s2614_s16   ;;  %s2121_s15 = sphi %s2157_s15, %s2613_s15  }
   0x3   : > { %p28_p1 = scmp.ge.s32.totalorder %s26_s18, 4  ;;  %p203_p2 = scmp.lt.s32.totalorder %s2129_s17, 5 }
   0x5   : > { %s2616_s18 = smov (%p28_p1, %s26_s18), 0  ;;  %p204_p3 = pnand %p1719_p0, %p203_p2 }
   0x6   : > { %v1995_v0 = vld [vmem:[%s2609_s1] sm:$0xff] (!%p204_p3)   ;;  %v2131_v1 = vmov (!%p204_p3), 0   ;;  %s1720_s21 = sshll.u32 (!%p204_p3), %s2121_s15, 6  ;;  %v1996_v2 = vld [vmem:[%s2609_s1 + $0x8] sm:$0xff] (!%p204_p3)   ;;  %v1997_v3 = vld [vmem:[%s2609_s1 + $0x10] sm:$0xff] (!%p204_p3)   ;;  %vm1533_vm0 = vcmask (!%p204_p3), 519168  }
   0x7   : > { %207 = sbr.rel (%p204_p3) target bundleno = 414 (0x19e), region = 36  ;;  %782 = vmatprep.subr.bf16.mxu0 (!%p204_p3), %v2131_v1  ;;  %1938 = vmatprep.subr.bf16.mxu1 (!%p204_p3), %v2131_v1  ;;  %p244_p4 = scmp.lt.s32.totalorder (!%p204_p3), %s1720_s21, 255  ;;  %v1998_v4 = vld [vmem:[%s2609_s1 + $0x18] sm:$0xff] (!%p204_p3)   ;;  %v1999_v5 = vld [vmem:[%s2609_s1 + $0x20] sm:$0xff] (!%p204_p3)   ;;  %v2000_v7 = vld [vmem:[%s2609_s1 + $0x28] sm:$0xff] (!%p204_p3)  }
   0x8   : > { %783 = vmatpush1.bf16.msra.mxu0 (!%p204_p3), %v1995_v0  ;;  %1954 = vmatpush1.bf16.msra.mxu1 (!%p204_p3), %v1995_v0  ;;  %v2001_v9 = vld [vmem:[%s2609_s1 + $0x30] sm:$0xff] (!%p204_p3)   ;;  %v2002_v10 = vld [vmem:[%s2609_s1 + $0x38] sm:$0xff] (!%p204_p3)   ;;  %v2003_v11 = vld [vmem:[%s2609_s1 + $0x40] sm:$0xff] (!%p204_p3)  }
   0x9   : > { %784 = vmatprep.subr.bf16.mxu0 (!%p204_p3), %v2131_v1  ;;  %1939 = vmatprep.subr.bf16.mxu1 (!%p204_p3), %v2131_v1  ;;  %v2004_v12 = vld [vmem:[%s2609_s1 + $0x48] sm:$0xff] (!%p204_p3)   ;;  %v2005_v13 = vld [vmem:[%s2609_s1 + $0x50] sm:$0xff] (!%p204_p3)   ;;  %v2006_v14 = vld [vmem:[%s2609_s1 + $0x58] sm:$0xff] (!%p204_p3)  }
   0xa   : > { %v2007_v15 = vld [vmem:[%s2609_s1 + $0x60] sm:$0xff] (!%p204_p3)   ;;  %v2008_v16 = vld [vmem:[%s2609_s1 + $0x68] sm:$0xff] (!%p204_p3)   ;;  %v2009_v17 = vld [vmem:[%s2609_s1 + $0x70] sm:$0xff] (!%p204_p3)  }
   0xb   : > { %v2010_v18 = vld [vmem:[%s2609_s1 + $0x78] sm:$0xff] (!%p204_p3)  }
   0xc   : > { %785 = vmatpush1.bf16.msra.mxu0 (!%p204_p3), %v1996_v2  ;;  %1955 = vmatpush1.bf16.msra.mxu1 (!%p204_p3), %v1996_v2 }
   0xd   : > { %786 = vmatprep.subr.bf16.mxu0 (!%p204_p3), %v2131_v1  ;;  %1940 = vmatprep.subr.bf16.mxu1 (!%p204_p3), %v2131_v1 }
   0xe   : > { %s2618_s21 = smov (!%p244_p4, %s1720_s21), 255 }
   0xf   : > { %s1873_s28 = sshll.u32 %s2618_s21, 3 }
  0x10   : > { %787 = vmatpush1.bf16.msra.mxu0 %v1997_v3  ;;  %1956 = vmatpush1.bf16.msra.mxu1 %v1997_v3  ;;  %s2204_s7 = scalar_lea.vmem %s2608_s0, %s1873_s28 }
  0x11   : > { %788 = vmatprep.subr.bf16.mxu0 %v2131_v1  ;;  %1941 = vmatprep.subr.bf16.mxu1 %v2131_v1  ;;  %v2013_v6 = vld [vmem:[%s2204_s7 + $0x4] ss:$8 sps:$4 sm:$0xff]   ;;  %v2011_v19 = vld [vmem:[%s2204_s7] ss:$8 sps:$4 sm:$0xff]   ;;  %v2017_v21 = vld [vmem:[%s2204_s7 + $0x14] ss:$8 sps:$4 sm:$0xff]  }
  0x12   : > { %v2016_v8 = vld [vmem:[%s2204_s7 + $0x104] ss:$8 sps:$4 sm:$0xff]   ;;  %814 = vmatprep.mubr.bf16.mxu0 %v2013_v6  ;;  %v2014_v20 = vld [vmem:[%s2204_s7 + $0x100] ss:$8 sps:$4 sm:$0xff]   ;;  %v2019_v22 = vld [vmem:[%s2204_s7 + $0x114] ss:$8 sps:$4 sm:$0xff]  }
  0x13   : > { %942 = vmatprep.mubr.bf16.mxu1 %v2016_v8  ;;  %v2021_v23 = vld [vmem:[%s2204_s7 + $0x10] ss:$8 sps:$4 sm:$0xff]   ;;  %v2023_v25 = vld [vmem:[%s2204_s7 + $0x24] ss:$8 sps:$4 sm:$0xff]   ;;  %v2027_v27 = vld [vmem:[%s2204_s7 + $0x20] ss:$8 sps:$4 sm:$0xff]  }
  0x14   : > { %789 = vmatpush1.bf16.msra.mxu0 %v1998_v4  ;;  %1957 = vmatpush1.bf16.msra.mxu1 %v1998_v4  ;;  %v2022_v24 = vld [vmem:[%s2204_s7 + $0x110] ss:$8 sps:$4 sm:$0xff]   ;;  %v2025_v26 = vld [vmem:[%s2204_s7 + $0x124] ss:$8 sps:$4 sm:$0xff]   ;;  %v2028_v28 = vld [vmem:[%s2204_s7 + $0x120] ss:$8 sps:$4 sm:$0xff]  }
  0x15   : > { %790 = vmatprep.subr.bf16.mxu0 %v2131_v1  ;;  %1942 = vmatprep.subr.bf16.mxu1 %v2131_v1  ;;  %v2029_v29 = vld [vmem:[%s2204_s7 + $0x34] ss:$8 sps:$4 sm:$0xff]   ;;  %v2033_v31 = vld [vmem:[%s2204_s7 + $0x30] ss:$8 sps:$4 sm:$0xff]   ;;  %v2035_v33 = vld [vmem:[%s2204_s7 + $0x44] ss:$8 sps:$4 sm:$0xff]  }
  0x16   : > { %v2031_v30 = vld [vmem:[%s2204_s7 + $0x134] ss:$8 sps:$4 sm:$0xff]   ;;  %v2034_v32 = vld [vmem:[%s2204_s7 + $0x130] ss:$8 sps:$4 sm:$0xff]   ;;  %v2037_v34 = vld [vmem:[%s2204_s7 + $0x144] ss:$8 sps:$4 sm:$0xff]  }
  0x17   : > { %v2039_v35 = vld [vmem:[%s2204_s7 + $0x40] ss:$8 sps:$4 sm:$0xff]   ;;  %v2041_v37 = vld [vmem:[%s2204_s7 + $0x54] ss:$8 sps:$4 sm:$0xff]   ;;  %v2045_v39 = vld [vmem:[%s2204_s7 + $0x50] ss:$8 sps:$4 sm:$0xff]  }
  0x18   : > { %791 = vmatpush1.bf16.msra.mxu0 %v1999_v5  ;;  %1958 = vmatpush1.bf16.msra.mxu1 %v1999_v5  ;;  %v2040_v36 = vld [vmem:[%s2204_s7 + $0x140] ss:$8 sps:$4 sm:$0xff]   ;;  %v2043_v38 = vld [vmem:[%s2204_s7 + $0x154] ss:$8 sps:$4 sm:$0xff]   ;;  %v2046_v40 = vld [vmem:[%s2204_s7 + $0x150] ss:$8 sps:$4 sm:$0xff]  }
  0x19   : > { %792 = vmatprep.subr.bf16.mxu0 %v2131_v1  ;;  %1943 = vmatprep.subr.bf16.mxu1 %v2131_v1  ;;  %v2047_v41 = vld [vmem:[%s2204_s7 + $0x64] ss:$8 sps:$4 sm:$0xff]   ;;  %v2051_v43 = vld [vmem:[%s2204_s7 + $0x60] ss:$8 sps:$4 sm:$0xff]   ;;  %v2053_v45 = vld [vmem:[%s2204_s7 + $0x74] ss:$8 sps:$4 sm:$0xff]  }
  0x1a   : > { %v2049_v42 = vld [vmem:[%s2204_s7 + $0x164] ss:$8 sps:$4 sm:$0xff]   ;;  %v2052_v44 = vld [vmem:[%s2204_s7 + $0x160] ss:$8 sps:$4 sm:$0xff]   ;;  %v2055_v46 = vld [vmem:[%s2204_s7 + $0x174] ss:$8 sps:$4 sm:$0xff]  }
  0x1b   : > { %v2057_v47 = vld [vmem:[%s2204_s7 + $0x70] ss:$8 sps:$4 sm:$0xff]   ;;  %v2059_v49 = vld [vmem:[%s2204_s7 + $0x84] ss:$8 sps:$4 sm:$0xff]   ;;  %v2063_v51 = vld [vmem:[%s2204_s7 + $0x80] ss:$8 sps:$4 sm:$0xff]  }
  0x1c   : > { %793 = vmatpush1.bf16.msra.mxu0 %v2000_v7  ;;  %1959 = vmatpush1.bf16.msra.mxu1 %v2000_v7  ;;  %v2058_v48 = vld [vmem:[%s2204_s7 + $0x170] ss:$8 sps:$4 sm:$0xff]   ;;  %v2061_v50 = vld [vmem:[%s2204_s7 + $0x184] ss:$8 sps:$4 sm:$0xff]   ;;  %v2064_v52 = vld [vmem:[%s2204_s7 + $0x180] ss:$8 sps:$4 sm:$0xff]  }
  0x1d   : > { %794 = vmatprep.subr.bf16.mxu0 %v2131_v1  ;;  %1944 = vmatprep.subr.bf16.mxu1 %v2131_v1  ;;  %v2065_v53 = vld [vmem:[%s2204_s7 + $0x94] ss:$8 sps:$4 sm:$0xff]   ;;  %v2069_v55 = vld [vmem:[%s2204_s7 + $0x90] ss:$8 sps:$4 sm:$0xff]   ;;  %v2071_v57 = vld [vmem:[%s2204_s7 + $0xa4] ss:$8 sps:$4 sm:$0xff]  }
  0x1e   : > { %v2067_v54 = vld [vmem:[%s2204_s7 + $0x194] ss:$8 sps:$4 sm:$0xff]   ;;  %v2070_v56 = vld [vmem:[%s2204_s7 + $0x190] ss:$8 sps:$4 sm:$0xff]   ;;  %v2073_v58 = vld [vmem:[%s2204_s7 + $0x1a4] ss:$8 sps:$4 sm:$0xff]  }
  0x1f   : > { %v2075_v59 = vld [vmem:[%s2204_s7 + $0xa0] ss:$8 sps:$4 sm:$0xff]   ;;  %v2077_v61 = vld [vmem:[%s2204_s7 + $0xb4] ss:$8 sps:$4 sm:$0xff]   ;;  %v2081_v63 = vld [vmem:[%s2204_s7 + $0xb0] ss:$8 sps:$4 sm:$0xff]  }
  0x20   : > { %795 = vmatpush1.bf16.msra.mxu0 %v2001_v9  ;;  %1960 = vmatpush1.bf16.msra.mxu1 %v2001_v9  ;;  %v2076_v60 = vld [vmem:[%s2204_s7 + $0x1a0] ss:$8 sps:$4 sm:$0xff]   ;;  %v2079_v62 = vld [vmem:[%s2204_s7 + $0x1b4] ss:$8 sps:$4 sm:$0xff]   ;;  %v2082_v0 = vld [vmem:[%s2204_s7 + $0x1b0] ss:$8 sps:$4 sm:$0xff]  }
  0x21   : > { %796 = vmatprep.subr.bf16.mxu0 %v2131_v1  ;;  %1945 = vmatprep.subr.bf16.mxu1 %v2131_v1  ;;  %v2085_v2 = vld [vmem:[%s2204_s7 + $0x1c4] ss:$8 sps:$4 sm:$0xff]   ;;  %v2087_v3 = vld [vmem:[%s2204_s7 + $0xc0] ss:$8 sps:$4 sm:$0xff]   ;;  %v2089_v5 = vld [vmem:[%s2204_s7 + $0xd4] ss:$8 sps:$4 sm:$0xff]  }
  0x22   : > { %v2088_v4 = vld [vmem:[%s2204_s7 + $0x1c0] ss:$8 sps:$4 sm:$0xff]   ;;  %v2091_v6 = vld [vmem:[%s2204_s7 + $0x1d4] ss:$8 sps:$4 sm:$0xff]   ;;  %v2093_v7 = vld [vmem:[%s2204_s7 + $0xd0] ss:$8 sps:$4 sm:$0xff]  }
  0x23   : > { %v2094_v8 = vld [vmem:[%s2204_s7 + $0x1d0] ss:$8 sps:$4 sm:$0xff]   ;;  %v2095_v9 = vld [vmem:[%s2204_s7 + $0xe4] ss:$8 sps:$4 sm:$0xff]  }
  0x24   : > { %797 = vmatpush1.bf16.msra.mxu0 %v2002_v10  ;;  %1961 = vmatpush1.bf16.msra.mxu1 %v2002_v10  ;;  %v2097_v10 = vld [vmem:[%s2204_s7 + $0x1e4] ss:$8 sps:$4 sm:$0xff]  }
  0x25   : > { %798 = vmatprep.subr.bf16.mxu0 %v2131_v1  ;;  %1946 = vmatprep.subr.bf16.mxu1 %v2131_v1 }
  0x28   : > { %799 = vmatpush1.bf16.msra.mxu0 %v2003_v11  ;;  %1962 = vmatpush1.bf16.msra.mxu1 %v2003_v11  ;;  %v2099_v11 = vld [vmem:[%s2204_s7 + $0xe0] ss:$8 sps:$4 sm:$0xff]  }
  0x29   : > { %800 = vmatprep.subr.bf16.mxu0 %v2131_v1  ;;  %1947 = vmatprep.subr.bf16.mxu1 %v2131_v1 }
  0x2c   : > { %801 = vmatpush1.bf16.msra.mxu0 %v2004_v12  ;;  %1963 = vmatpush1.bf16.msra.mxu1 %v2004_v12  ;;  %v2100_v12 = vld [vmem:[%s2204_s7 + $0x1e0] ss:$8 sps:$4 sm:$0xff]  }
  0x2d   : > { %802 = vmatprep.subr.bf16.mxu0 %v2131_v1  ;;  %1948 = vmatprep.subr.bf16.mxu1 %v2131_v1 }
  0x30   : > { %803 = vmatpush1.bf16.msra.mxu0 %v2005_v13  ;;  %1964 = vmatpush1.bf16.msra.mxu1 %v2005_v13  ;;  %v2101_v13 = vld [vmem:[%s2204_s7 + $0xf4] ss:$8 sps:$4 sm:$0xff]  }
  0x31   : > { %804 = vmatprep.subr.bf16.mxu0 %v2131_v1  ;;  %1949 = vmatprep.subr.bf16.mxu1 %v2131_v1 }
  0x34   : > { %805 = vmatpush1.bf16.msra.mxu0 %v2006_v14  ;;  %1965 = vmatpush1.bf16.msra.mxu1 %v2006_v14  ;;  %v2103_v14 = vld [vmem:[%s2204_s7 + $0x1f4] ss:$8 sps:$4 sm:$0xff]  }
  0x35   : > { %806 = vmatprep.subr.bf16.mxu0 %v2131_v1  ;;  %1950 = vmatprep.subr.bf16.mxu1 %v2131_v1 }
  0x38   : > { %807 = vmatpush1.bf16.msra.mxu0 %v2007_v15  ;;  %1966 = vmatpush1.bf16.msra.mxu1 %v2007_v15  ;;  %v2105_v15 = vld [vmem:[%s2204_s7 + $0xf0] ss:$8 sps:$4 sm:$0xff]  }
  0x39   : > { %808 = vmatprep.subr.bf16.mxu0 %v2131_v1  ;;  %1951 = vmatprep.subr.bf16.mxu1 %v2131_v1 }
  0x3c   : > { %809 = vmatpush1.bf16.msra.mxu0 %v2008_v16  ;;  %1967 = vmatpush1.bf16.msra.mxu1 %v2008_v16  ;;  %v2106_v16 = vld [vmem:[%s2204_s7 + $0x1f0] ss:$8 sps:$4 sm:$0xff]  }
  0x3d   : > { %810 = vmatprep.subr.bf16.mxu0 %v2131_v1  ;;  %1952 = vmatprep.subr.bf16.mxu1 %v2131_v1 }
  0x40   : > { %811 = vmatpush1.bf16.msra.mxu0 %v2009_v17  ;;  %1968 = vmatpush1.bf16.msra.mxu1 %v2009_v17  ;;  %v2330_v17 = vld [vmem:[%s2610_s2] ss:$0 sm:$0xff] }
  0x41   : > { %812 = vmatprep.subr.bf16.mxu0 %v2131_v1  ;;  %1953 = vmatprep.subr.bf16.mxu1 %v2131_v1  ;;  %v2083_v1 = vld [vmem:[%s2204_s7 + $0xc4] ss:$8 sps:$4 sm:$0xff]   ;;  %s1724_s7 = sshll.u32 %s2618_s21, 2 }
  0x42   : > { %s2349_s21 = scalar_lea.vmem %s2612_s4, %s1724_s7 }
  0x44   : > { %813 = vmatpush1.bf16.msra.mxu0 %v2010_v18  ;;  %1969 = vmatpush1.bf16.msra.mxu1 %v2010_v18 }
  0x47   : > { %815 = vmatmul.mubr.bf16.vlgmr.msra.gmra.mrb[0].mxu0 %v2011_v19  ;;  %943 = vmatmul.mubr.bf16.vlgmr.msra.gmra.mrb[0].mxu1 %v2014_v20  ;;  %v2335_v19 = vld [vmem:[%s2611_s3] ss:$0 sm:$0xff] }
  0x48   : > { %822 = vmatprep.mubr.bf16.mxu0 %v2017_v21  ;;  %950 = vmatprep.mubr.bf16.mxu1 %v2019_v22 }
  0x4f   : > { %823 = vmatmul.mubr.bf16.gmra.mrb[4].mxu0 %v2021_v23  ;;  %951 = vmatmul.mubr.bf16.gmra.mrb[4].mxu1 %v2022_v24 }
  0x50   : > { %830 = vmatprep.mubr.bf16.mxu0 %v2023_v25  ;;  %958 = vmatprep.mubr.bf16.mxu1 %v2025_v26 }
  0x57   : > { %831 = vmatmul.mubr.bf16.gmra.mrb[8].mxu0 %v2027_v27  ;;  %959 = vmatmul.mubr.bf16.gmra.mrb[8].mxu1 %v2028_v28 }
  0x58   : > { %838 = vmatprep.mubr.bf16.mxu0 %v2029_v29  ;;  %966 = vmatprep.mubr.bf16.mxu1 %v2031_v30 }
  0x5f   : > { %839 = vmatmul.mubr.bf16.gmra.mrb[12].mxu0 %v2033_v31  ;;  %967 = vmatmul.mubr.bf16.gmra.mrb[12].mxu1 %v2034_v32 }
  0x60   : > { %846 = vmatprep.mubr.bf16.mxu0 %v2035_v33  ;;  %974 = vmatprep.mubr.bf16.mxu1 %v2037_v34 }
  0x67   : > { %847 = vmatmul.mubr.bf16.gmra.mrb[16].mxu0 %v2039_v35  ;;  %975 = vmatmul.mubr.bf16.gmra.mrb[16].mxu1 %v2040_v36 }
  0x68   : > { %854 = vmatprep.mubr.bf16.mxu0 %v2041_v37  ;;  %982 = vmatprep.mubr.bf16.mxu1 %v2043_v38 }
  0x6f   : > { %855 = vmatmul.mubr.bf16.gmra.mrb[20].mxu0 %v2045_v39  ;;  %983 = vmatmul.mubr.bf16.gmra.mrb[20].mxu1 %v2046_v40 }
  0x70   : > { %862 = vmatprep.mubr.bf16.mxu0 %v2047_v41  ;;  %990 = vmatprep.mubr.bf16.mxu1 %v2049_v42 }
  0x77   : > { %863 = vmatmul.mubr.bf16.gmra.mrb[24].mxu0 %v2051_v43  ;;  %991 = vmatmul.mubr.bf16.gmra.mrb[24].mxu1 %v2052_v44 }
  0x78   : > { %870 = vmatprep.mubr.bf16.mxu0 %v2053_v45  ;;  %998 = vmatprep.mubr.bf16.mxu1 %v2055_v46 }
  0x7f   : > { %871 = vmatmul.mubr.bf16.gmra.mrb[28].mxu0 %v2057_v47  ;;  %999 = vmatmul.mubr.bf16.gmra.mrb[28].mxu1 %v2058_v48 }
  0x80   : > { %878 = vmatprep.mubr.bf16.mxu0 %v2059_v49  ;;  %1006 = vmatprep.mubr.bf16.mxu1 %v2061_v50 }
  0x87   : > { %879 = vmatmul.mubr.bf16.gmra.mrb[32].mxu0 %v2063_v51  ;;  %1007 = vmatmul.mubr.bf16.gmra.mrb[32].mxu1 %v2064_v52 }
  0x88   : > { %886 = vmatprep.mubr.bf16.mxu0 %v2065_v53  ;;  %1014 = vmatprep.mubr.bf16.mxu1 %v2067_v54 }
  0x8f   : > { %887 = vmatmul.mubr.bf16.gmra.mrb[36].mxu0 %v2069_v55  ;;  %1015 = vmatmul.mubr.bf16.gmra.mrb[36].mxu1 %v2070_v56 }
  0x90   : > { %894 = vmatprep.mubr.bf16.mxu0 %v2071_v57  ;;  %1022 = vmatprep.mubr.bf16.mxu1 %v2073_v58 }
  0x97   : > { %895 = vmatmul.mubr.bf16.gmra.mrb[40].mxu0 %v2075_v59  ;;  %1023 = vmatmul.mubr.bf16.gmra.mrb[40].mxu1 %v2076_v60 }
  0x98   : > { %902 = vmatprep.mubr.bf16.mxu0 %v2077_v61  ;;  %1030 = vmatprep.mubr.bf16.mxu1 %v2079_v62 }
  0x9f   : > { %903 = vmatmul.mubr.bf16.gmra.mrb[44].mxu0 %v2081_v63  ;;  %1031 = vmatmul.mubr.bf16.gmra.mrb[44].mxu1 %v2082_v0 }
  0xa0   : > { %910 = vmatprep.mubr.bf16.mxu0 %v2083_v1  ;;  %1038 = vmatprep.mubr.bf16.mxu1 %v2085_v2 }
  0xa7   : > { %911 = vmatmul.mubr.bf16.gmra.mrb[48].mxu0 %v2087_v3  ;;  %1039 = vmatmul.mubr.bf16.gmra.mrb[48].mxu1 %v2088_v4 }
  0xa8   : > { %918 = vmatprep.mubr.bf16.mxu0 %v2089_v5  ;;  %1046 = vmatprep.mubr.bf16.mxu1 %v2091_v6 }
  0xaf   : > { %919 = vmatmul.mubr.bf16.gmra.mrb[52].mxu0 %v2093_v7  ;;  %1047 = vmatmul.mubr.bf16.gmra.mrb[52].mxu1 %v2094_v8 }
  0xb0   : > { %926 = vmatprep.mubr.bf16.mxu0 %v2095_v9  ;;  %1054 = vmatprep.mubr.bf16.mxu1 %v2097_v10 }
  0xb7   : > { %927 = vmatmul.mubr.bf16.gmra.mrb[56].mxu0 %v2099_v11  ;;  %1055 = vmatmul.mubr.bf16.gmra.mrb[56].mxu1 %v2100_v12 }
  0xb8   : > { %934 = vmatprep.mubr.bf16.mxu0 %v2101_v13  ;;  %1062 = vmatprep.mubr.bf16.mxu1 %v2103_v14 }
  0xbf   : > { %935 = vmatmul.mubr.bf16.gmra.mrb[60].mxu0 %v2105_v15  ;;  %1063 = vmatmul.mubr.bf16.gmra.mrb[60].mxu1 %v2106_v16 }
 0x11a   : > { %v816_v18 = vpop.f32.mrb[0].mxu0  ;;  %v944_v20 = vpop.f32.mrb[0].mxu1 }
 0x11b   : > { %v1078_v21 = vmul.f32 %v2330_v17, %v816_v18  ;;  %v1110_v22 = vmul.f32 %v2330_v17, %v944_v20  ;;  %v818_v23 = vpop.f32.mrb[1].mxu0  ;;  %v946_v24 = vpop.f32.mrb[1].mxu1 }
 0x11c   : > { %v819_v25 = vpop.f32.mrb[2].mxu0  ;;  %v947_v26 = vpop.f32.mrb[2].mxu1 }
 0x11d   : > { %v1149_v27 = vadd.f32 %v2335_v19, %v1078_v21  ;;  %v1181_v28 = vadd.f32 %v2335_v19, %v1110_v22  ;;  %v1079_v29 = vmul.f32 %v2330_v17, %v819_v25  ;;  %v1111_v30 = vmul.f32 %v2330_v17, %v947_v26  ;;  %v821_v31 = vpop.f32.mrb[3].mxu0  ;;  %v949_v32 = vpop.f32.mrb[3].mxu1 }
 0x11f   : > { %v1213_v33 = vmax.f32 %v1149_v27, 0.0  ;;  %v1245_v34 = vmax.f32 %v1181_v28, 0.0  ;;  %v1150_v35 = vadd.f32 %v2335_v19, %v1079_v29  ;;  %v1182_v36 = vadd.f32 %v2335_v19, %v1111_v30 }
 0x121   : > { %v1874_v37 = vpack.c.bf16 %v1213_v33, %v1213_v33  ;;  %v1906_v38 = vpack.c.bf16 %v1245_v34, %v1245_v34  ;;  %v1214_v39 = vmax.f32 %v1150_v35, 0.0  ;;  %v1246_v40 = vmax.f32 %v1182_v36, 0.0 }
 0x122   : > { %v824_v41 = vpop.f32.mrb[4].mxu0  ;;  %v952_v42 = vpop.f32.mrb[4].mxu1 }
 0x123   : > { %1534 = vst.msk [vmem:[%s2349_s21] sm:$0xf] %vm1533_vm0, %v1874_v37  ;;  %1566 = vst.msk [vmem:[%s2349_s21 + $0x80] sm:$0xf] %vm1533_vm0, %v1906_v38  ;;  %v1875_v43 = vpack.c.bf16 %v1214_v39, %v1214_v39  ;;  %v1907_v44 = vpack.c.bf16 %v1246_v40, %v1246_v40  ;;  %v1080_v45 = vmul.f32 %v2330_v17, %v824_v41  ;;  %v826_v47 = vpop.f32.mrb[5].mxu0  ;;  %v954_v48 = vpop.f32.mrb[5].mxu1 }
 0x124   : > { %v1112_v46 = vmul.f32 %v2330_v17, %v952_v42  ;;  %v827_v49 = vpop.f32.mrb[6].mxu0  ;;  %v955_v50 = vpop.f32.mrb[6].mxu1 }
 0x125   : > { %1535 = vst.msk [vmem:[%s2349_s21 + $0x4] sm:$0xf] %vm1533_vm0, %v1875_v43  ;;  %1567 = vst.msk [vmem:[%s2349_s21 + $0x84] sm:$0xf] %vm1533_vm0, %v1907_v44  ;;  %v1151_v51 = vadd.f32 %v2335_v19, %v1080_v45  ;;  %v1081_v53 = vmul.f32 %v2330_v17, %v827_v49  ;;  %v1113_v54 = vmul.f32 %v2330_v17, %v955_v50  ;;  %v829_v55 = vpop.f32.mrb[7].mxu0  ;;  %v957_v56 = vpop.f32.mrb[7].mxu1 }
 0x126   : > { %v1183_v52 = vadd.f32 %v2335_v19, %v1112_v46 }
 0x127   : > { %v1215_v57 = vmax.f32 %v1151_v51, 0.0  ;;  %v1152_v59 = vadd.f32 %v2335_v19, %v1081_v53  ;;  %v1184_v60 = vadd.f32 %v2335_v19, %v1113_v54 }
 0x128   : > { %v1247_v58 = vmax.f32 %v1183_v52, 0.0 }
 0x129   : > { %v1876_v61 = vpack.c.bf16 %v1215_v57, %v1215_v57  ;;  %v1216_v63 = vmax.f32 %v1152_v59, 0.0  ;;  %v1248_v0 = vmax.f32 %v1184_v60, 0.0 }
 0x12a   : > { %v1908_v62 = vpack.c.bf16 %v1247_v58, %v1247_v58  ;;  %v832_v1 = vpop.f32.mrb[8].mxu0  ;;  %v960_v2 = vpop.f32.mrb[8].mxu1 }
 0x12b   : > { %1536 = vst.msk [vmem:[%s2349_s21 + $0x8] sm:$0xf] %vm1533_vm0, %v1876_v61  ;;  %v1877_v3 = vpack.c.bf16 %v1216_v63, %v1216_v63  ;;  %v1909_v4 = vpack.c.bf16 %v1248_v0, %v1248_v0  ;;  %v1082_v5 = vmul.f32 %v2330_v17, %v832_v1  ;;  %v1114_v6 = vmul.f32 %v2330_v17, %v960_v2  ;;  %v834_v7 = vpop.f32.mrb[9].mxu0  ;;  %v962_v8 = vpop.f32.mrb[9].mxu1 }
 0x12c   : > { %1568 = vst.msk [vmem:[%s2349_s21 + $0x88] sm:$0xf] %vm1533_vm0, %v1908_v62  ;;  %v835_v9 = vpop.f32.mrb[10].mxu0  ;;  %v963_v10 = vpop.f32.mrb[10].mxu1 }
 0x12d   : > { %1537 = vst.msk [vmem:[%s2349_s21 + $0xc] sm:$0xf] %vm1533_vm0, %v1877_v3  ;;  %1569 = vst.msk [vmem:[%s2349_s21 + $0x8c] sm:$0xf] %vm1533_vm0, %v1909_v4  ;;  %v1153_v11 = vadd.f32 %v2335_v19, %v1082_v5  ;;  %v1185_v12 = vadd.f32 %v2335_v19, %v1114_v6  ;;  %v1083_v13 = vmul.f32 %v2330_v17, %v835_v9  ;;  %v837_v15 = vpop.f32.mrb[11].mxu0  ;;  %v965_v16 = vpop.f32.mrb[11].mxu1 }
 0x12e   : > { %v1115_v14 = vmul.f32 %v2330_v17, %v963_v10 }
 0x12f   : > { %v1217_v18 = vmax.f32 %v1153_v11, 0.0  ;;  %v1249_v20 = vmax.f32 %v1185_v12, 0.0  ;;  %v1154_v21 = vadd.f32 %v2335_v19, %v1083_v13 }
 0x130   : > { %v1186_v22 = vadd.f32 %v2335_v19, %v1115_v14 }
 0x131   : > { %v1878_v23 = vpack.c.bf16 %v1217_v18, %v1217_v18  ;;  %v1910_v24 = vpack.c.bf16 %v1249_v20, %v1249_v20  ;;  %v1218_v25 = vmax.f32 %v1154_v21, 0.0 }
 0x132   : > { %v1250_v26 = vmax.f32 %v1186_v22, 0.0  ;;  %v840_v27 = vpop.f32.mrb[12].mxu0  ;;  %v968_v28 = vpop.f32.mrb[12].mxu1 }
 0x133   : > { %1538 = vst.msk [vmem:[%s2349_s21 + $0x10] sm:$0xf] %vm1533_vm0, %v1878_v23  ;;  %1570 = vst.msk [vmem:[%s2349_s21 + $0x90] sm:$0xf] %vm1533_vm0, %v1910_v24  ;;  %v1879_v29 = vpack.c.bf16 %v1218_v25, %v1218_v25  ;;  %v1084_v31 = vmul.f32 %v2330_v17, %v840_v27  ;;  %v1116_v32 = vmul.f32 %v2330_v17, %v968_v28  ;;  %v842_v33 = vpop.f32.mrb[13].mxu0  ;;  %v970_v34 = vpop.f32.mrb[13].mxu1 }
 0x134   : > { %v1911_v30 = vpack.c.bf16 %v1250_v26, %v1250_v26  ;;  %v843_v35 = vpop.f32.mrb[14].mxu0  ;;  %v971_v36 = vpop.f32.mrb[14].mxu1 }
 0x135   : > { %1539 = vst.msk [vmem:[%s2349_s21 + $0x14] sm:$0xf] %vm1533_vm0, %v1879_v29  ;;  %v1155_v37 = vadd.f32 %v2335_v19, %v1084_v31  ;;  %v1187_v38 = vadd.f32 %v2335_v19, %v1116_v32  ;;  %v1085_v39 = vmul.f32 %v2330_v17, %v843_v35  ;;  %v1117_v40 = vmul.f32 %v2330_v17, %v971_v36  ;;  %v845_v41 = vpop.f32.mrb[15].mxu0  ;;  %v973_v42 = vpop.f32.mrb[15].mxu1 }
 0x136   : > { %1571 = vst.msk [vmem:[%s2349_s21 + $0x94] sm:$0xf] %vm1533_vm0, %v1911_v30 }
 0x137   : > { %v1219_v43 = vmax.f32 %v1155_v37, 0.0  ;;  %v1251_v44 = vmax.f32 %v1187_v38, 0.0  ;;  %v1156_v45 = vadd.f32 %v2335_v19, %v1085_v39  ;;  %v1188_v46 = vadd.f32 %v2335_v19, %v1117_v40 }
 0x139   : > { %v1880_v47 = vpack.c.bf16 %v1219_v43, %v1219_v43  ;;  %v1912_v48 = vpack.c.bf16 %v1251_v44, %v1251_v44  ;;  %v1220_v49 = vmax.f32 %v1156_v45, 0.0  ;;  %v1252_v50 = vmax.f32 %v1188_v46, 0.0 }
 0x13a   : > { %v848_v51 = vpop.f32.mrb[16].mxu0  ;;  %v976_v52 = vpop.f32.mrb[16].mxu1 }
 0x13b   : > { %1540 = vst.msk [vmem:[%s2349_s21 + $0x18] sm:$0xf] %vm1533_vm0, %v1880_v47  ;;  %1572 = vst.msk [vmem:[%s2349_s21 + $0x98] sm:$0xf] %vm1533_vm0, %v1912_v48  ;;  %v1881_v53 = vpack.c.bf16 %v1220_v49, %v1220_v49  ;;  %v1913_v54 = vpack.c.bf16 %v1252_v50, %v1252_v50  ;;  %v1086_v55 = vmul.f32 %v2330_v17, %v848_v51  ;;  %v850_v57 = vpop.f32.mrb[17].mxu0  ;;  %v978_v58 = vpop.f32.mrb[17].mxu1 }
 0x13c   : > { %v1118_v56 = vmul.f32 %v2330_v17, %v976_v52  ;;  %v851_v59 = vpop.f32.mrb[18].mxu0  ;;  %v979_v60 = vpop.f32.mrb[18].mxu1 }
 0x13d   : > { %1541 = vst.msk [vmem:[%s2349_s21 + $0x1c] sm:$0xf] %vm1533_vm0, %v1881_v53  ;;  %1573 = vst.msk [vmem:[%s2349_s21 + $0x9c] sm:$0xf] %vm1533_vm0, %v1913_v54  ;;  %v1157_v61 = vadd.f32 %v2335_v19, %v1086_v55  ;;  %v1087_v63 = vmul.f32 %v2330_v17, %v851_v59  ;;  %v1119_v0 = vmul.f32 %v2330_v17, %v979_v60  ;;  %v853_v1 = vpop.f32.mrb[19].mxu0  ;;  %v981_v2 = vpop.f32.mrb[19].mxu1 }
 0x13e   : > { %v1189_v62 = vadd.f32 %v2335_v19, %v1118_v56 }
 0x13f   : > { %v1221_v3 = vmax.f32 %v1157_v61, 0.0  ;;  %v1158_v5 = vadd.f32 %v2335_v19, %v1087_v63  ;;  %v1190_v6 = vadd.f32 %v2335_v19, %v1119_v0 }
 0x140   : > { %v1253_v4 = vmax.f32 %v1189_v62, 0.0 }
 0x141   : > { %v1882_v7 = vpack.c.bf16 %v1221_v3, %v1221_v3  ;;  %v1222_v9 = vmax.f32 %v1158_v5, 0.0  ;;  %v1254_v10 = vmax.f32 %v1190_v6, 0.0 }
 0x142   : > { %v1914_v8 = vpack.c.bf16 %v1253_v4, %v1253_v4  ;;  %v856_v11 = vpop.f32.mrb[20].mxu0  ;;  %v984_v12 = vpop.f32.mrb[20].mxu1 }
 0x143   : > { %1542 = vst.msk [vmem:[%s2349_s21 + $0x20] sm:$0xf] %vm1533_vm0, %v1882_v7  ;;  %v1883_v13 = vpack.c.bf16 %v1222_v9, %v1222_v9  ;;  %v1915_v14 = vpack.c.bf16 %v1254_v10, %v1254_v10  ;;  %v1088_v15 = vmul.f32 %v2330_v17, %v856_v11  ;;  %v1120_v16 = vmul.f32 %v2330_v17, %v984_v12  ;;  %v858_v18 = vpop.f32.mrb[21].mxu0  ;;  %v986_v20 = vpop.f32.mrb[21].mxu1 }
 0x144   : > { %1574 = vst.msk [vmem:[%s2349_s21 + $0xa0] sm:$0xf] %vm1533_vm0, %v1914_v8  ;;  %v859_v21 = vpop.f32.mrb[22].mxu0  ;;  %v987_v22 = vpop.f32.mrb[22].mxu1 }
 0x145   : > { %1543 = vst.msk [vmem:[%s2349_s21 + $0x24] sm:$0xf] %vm1533_vm0, %v1883_v13  ;;  %1575 = vst.msk [vmem:[%s2349_s21 + $0xa4] sm:$0xf] %vm1533_vm0, %v1915_v14  ;;  %v1159_v23 = vadd.f32 %v2335_v19, %v1088_v15  ;;  %v1191_v24 = vadd.f32 %v2335_v19, %v1120_v16  ;;  %v1089_v25 = vmul.f32 %v2330_v17, %v859_v21  ;;  %v861_v27 = vpop.f32.mrb[23].mxu0  ;;  %v989_v28 = vpop.f32.mrb[23].mxu1 }
 0x146   : > { %v1121_v26 = vmul.f32 %v2330_v17, %v987_v22 }
 0x147   : > { %v1223_v29 = vmax.f32 %v1159_v23, 0.0  ;;  %v1255_v30 = vmax.f32 %v1191_v24, 0.0  ;;  %v1160_v31 = vadd.f32 %v2335_v19, %v1089_v25 }
 0x148   : > { %v1192_v32 = vadd.f32 %v2335_v19, %v1121_v26 }
 0x149   : > { %v1884_v33 = vpack.c.bf16 %v1223_v29, %v1223_v29  ;;  %v1916_v34 = vpack.c.bf16 %v1255_v30, %v1255_v30  ;;  %v1224_v35 = vmax.f32 %v1160_v31, 0.0 }
 0x14a   : > { %v1256_v36 = vmax.f32 %v1192_v32, 0.0  ;;  %v864_v37 = vpop.f32.mrb[24].mxu0  ;;  %v992_v38 = vpop.f32.mrb[24].mxu1 }
 0x14b   : > { %1544 = vst.msk [vmem:[%s2349_s21 + $0x28] sm:$0xf] %vm1533_vm0, %v1884_v33  ;;  %1576 = vst.msk [vmem:[%s2349_s21 + $0xa8] sm:$0xf] %vm1533_vm0, %v1916_v34  ;;  %v1885_v39 = vpack.c.bf16 %v1224_v35, %v1224_v35  ;;  %v1090_v41 = vmul.f32 %v2330_v17, %v864_v37  ;;  %v1122_v42 = vmul.f32 %v2330_v17, %v992_v38  ;;  %v866_v43 = vpop.f32.mrb[25].mxu0  ;;  %v994_v44 = vpop.f32.mrb[25].mxu1 }
 0x14c   : > { %v1917_v40 = vpack.c.bf16 %v1256_v36, %v1256_v36  ;;  %v867_v45 = vpop.f32.mrb[26].mxu0  ;;  %v995_v46 = vpop.f32.mrb[26].mxu1 }
 0x14d   : > { %1545 = vst.msk [vmem:[%s2349_s21 + $0x2c] sm:$0xf] %vm1533_vm0, %v1885_v39  ;;  %v1161_v47 = vadd.f32 %v2335_v19, %v1090_v41  ;;  %v1193_v48 = vadd.f32 %v2335_v19, %v1122_v42  ;;  %v1091_v49 = vmul.f32 %v2330_v17, %v867_v45  ;;  %v1123_v50 = vmul.f32 %v2330_v17, %v995_v46  ;;  %v869_v51 = vpop.f32.mrb[27].mxu0  ;;  %v997_v52 = vpop.f32.mrb[27].mxu1 }
 0x14e   : > { %1577 = vst.msk [vmem:[%s2349_s21 + $0xac] sm:$0xf] %vm1533_vm0, %v1917_v40 }
 0x14f   : > { %v1225_v53 = vmax.f32 %v1161_v47, 0.0  ;;  %v1257_v54 = vmax.f32 %v1193_v48, 0.0  ;;  %v1162_v55 = vadd.f32 %v2335_v19, %v1091_v49  ;;  %v1194_v56 = vadd.f32 %v2335_v19, %v1123_v50 }
 0x151   : > { %v1886_v57 = vpack.c.bf16 %v1225_v53, %v1225_v53  ;;  %v1918_v58 = vpack.c.bf16 %v1257_v54, %v1257_v54  ;;  %v1226_v59 = vmax.f32 %v1162_v55, 0.0  ;;  %v1258_v60 = vmax.f32 %v1194_v56, 0.0 }
 0x152   : > { %v872_v61 = vpop.f32.mrb[28].mxu0  ;;  %v1000_v62 = vpop.f32.mrb[28].mxu1 }
 0x153   : > { %1546 = vst.msk [vmem:[%s2349_s21 + $0x30] sm:$0xf] %vm1533_vm0, %v1886_v57  ;;  %1578 = vst.msk [vmem:[%s2349_s21 + $0xb0] sm:$0xf] %vm1533_vm0, %v1918_v58  ;;  %v1887_v63 = vpack.c.bf16 %v1226_v59, %v1226_v59  ;;  %v1919_v0 = vpack.c.bf16 %v1258_v60, %v1258_v60  ;;  %v1092_v1 = vmul.f32 %v2330_v17, %v872_v61  ;;  %v874_v3 = vpop.f32.mrb[29].mxu0  ;;  %v1002_v4 = vpop.f32.mrb[29].mxu1 }
 0x154   : > { %v1124_v2 = vmul.f32 %v2330_v17, %v1000_v62  ;;  %v875_v5 = vpop.f32.mrb[30].mxu0  ;;  %v1003_v6 = vpop.f32.mrb[30].mxu1 }
 0x155   : > { %1547 = vst.msk [vmem:[%s2349_s21 + $0x34] sm:$0xf] %vm1533_vm0, %v1887_v63  ;;  %1579 = vst.msk [vmem:[%s2349_s21 + $0xb4] sm:$0xf] %vm1533_vm0, %v1919_v0  ;;  %v1163_v7 = vadd.f32 %v2335_v19, %v1092_v1  ;;  %v1093_v9 = vmul.f32 %v2330_v17, %v875_v5  ;;  %v1125_v10 = vmul.f32 %v2330_v17, %v1003_v6  ;;  %v877_v11 = vpop.f32.mrb[31].mxu0  ;;  %v1005_v12 = vpop.f32.mrb[31].mxu1 }
 0x156   : > { %v1195_v8 = vadd.f32 %v2335_v19, %v1124_v2 }
 0x157   : > { %v1227_v13 = vmax.f32 %v1163_v7, 0.0  ;;  %v1164_v15 = vadd.f32 %v2335_v19, %v1093_v9  ;;  %v1196_v16 = vadd.f32 %v2335_v19, %v1125_v10 }
 0x158   : > { %v1259_v14 = vmax.f32 %v1195_v8, 0.0 }
 0x159   : > { %v1888_v18 = vpack.c.bf16 %v1227_v13, %v1227_v13  ;;  %v1228_v21 = vmax.f32 %v1164_v15, 0.0  ;;  %v1260_v22 = vmax.f32 %v1196_v16, 0.0 }
 0x15a   : > { %v1920_v20 = vpack.c.bf16 %v1259_v14, %v1259_v14  ;;  %v880_v23 = vpop.f32.mrb[32].mxu0  ;;  %v1008_v24 = vpop.f32.mrb[32].mxu1 }
 0x15b   : > { %1548 = vst.msk [vmem:[%s2349_s21 + $0x38] sm:$0xf] %vm1533_vm0, %v1888_v18  ;;  %v1889_v25 = vpack.c.bf16 %v1228_v21, %v1228_v21  ;;  %v1921_v26 = vpack.c.bf16 %v1260_v22, %v1260_v22  ;;  %v1094_v27 = vmul.f32 %v2330_v17, %v880_v23  ;;  %v1126_v28 = vmul.f32 %v2330_v17, %v1008_v24  ;;  %v882_v29 = vpop.f32.mrb[33].mxu0  ;;  %v1010_v30 = vpop.f32.mrb[33].mxu1 }
 0x15c   : > { %1580 = vst.msk [vmem:[%s2349_s21 + $0xb8] sm:$0xf] %vm1533_vm0, %v1920_v20  ;;  %v883_v31 = vpop.f32.mrb[34].mxu0  ;;  %v1011_v32 = vpop.f32.mrb[34].mxu1 }
 0x15d   : > { %1549 = vst.msk [vmem:[%s2349_s21 + $0x3c] sm:$0xf] %vm1533_vm0, %v1889_v25  ;;  %1581 = vst.msk [vmem:[%s2349_s21 + $0xbc] sm:$0xf] %vm1533_vm0, %v1921_v26  ;;  %v1165_v33 = vadd.f32 %v2335_v19, %v1094_v27  ;;  %v1197_v34 = vadd.f32 %v2335_v19, %v1126_v28  ;;  %v1095_v35 = vmul.f32 %v2330_v17, %v883_v31  ;;  %v885_v37 = vpop.f32.mrb[35].mxu0  ;;  %v1013_v38 = vpop.f32.mrb[35].mxu1 }
 0x15e   : > { %v1127_v36 = vmul.f32 %v2330_v17, %v1011_v32 }
 0x15f   : > { %v1229_v39 = vmax.f32 %v1165_v33, 0.0  ;;  %v1261_v40 = vmax.f32 %v1197_v34, 0.0  ;;  %v1166_v41 = vadd.f32 %v2335_v19, %v1095_v35 }
 0x160   : > { %v1198_v42 = vadd.f32 %v2335_v19, %v1127_v36 }
 0x161   : > { %v1890_v43 = vpack.c.bf16 %v1229_v39, %v1229_v39  ;;  %v1922_v44 = vpack.c.bf16 %v1261_v40, %v1261_v40  ;;  %v1230_v45 = vmax.f32 %v1166_v41, 0.0 }
 0x162   : > { %v1262_v46 = vmax.f32 %v1198_v42, 0.0  ;;  %v888_v47 = vpop.f32.mrb[36].mxu0  ;;  %v1016_v48 = vpop.f32.mrb[36].mxu1 }
 0x163   : > { %1550 = vst.msk [vmem:[%s2349_s21 + $0x40] sm:$0xf] %vm1533_vm0, %v1890_v43  ;;  %1582 = vst.msk [vmem:[%s2349_s21 + $0xc0] sm:$0xf] %vm1533_vm0, %v1922_v44  ;;  %v1891_v49 = vpack.c.bf16 %v1230_v45, %v1230_v45  ;;  %v1096_v51 = vmul.f32 %v2330_v17, %v888_v47  ;;  %v1128_v52 = vmul.f32 %v2330_v17, %v1016_v48  ;;  %v890_v53 = vpop.f32.mrb[37].mxu0  ;;  %v1018_v54 = vpop.f32.mrb[37].mxu1 }
 0x164   : > { %v1923_v50 = vpack.c.bf16 %v1262_v46, %v1262_v46  ;;  %v891_v55 = vpop.f32.mrb[38].mxu0  ;;  %v1019_v56 = vpop.f32.mrb[38].mxu1 }
 0x165   : > { %1551 = vst.msk [vmem:[%s2349_s21 + $0x44] sm:$0xf] %vm1533_vm0, %v1891_v49  ;;  %v1167_v57 = vadd.f32 %v2335_v19, %v1096_v51  ;;  %v1199_v58 = vadd.f32 %v2335_v19, %v1128_v52  ;;  %v1097_v59 = vmul.f32 %v2330_v17, %v891_v55  ;;  %v1129_v60 = vmul.f32 %v2330_v17, %v1019_v56  ;;  %v893_v61 = vpop.f32.mrb[39].mxu0  ;;  %v1021_v62 = vpop.f32.mrb[39].mxu1 }
 0x166   : > { %1583 = vst.msk [vmem:[%s2349_s21 + $0xc4] sm:$0xf] %vm1533_vm0, %v1923_v50 }
 0x167   : > { %v1231_v63 = vmax.f32 %v1167_v57, 0.0  ;;  %v1263_v0 = vmax.f32 %v1199_v58, 0.0  ;;  %v1168_v1 = vadd.f32 %v2335_v19, %v1097_v59  ;;  %v1200_v2 = vadd.f32 %v2335_v19, %v1129_v60 }
 0x169   : > { %v1892_v3 = vpack.c.bf16 %v1231_v63, %v1231_v63  ;;  %v1924_v4 = vpack.c.bf16 %v1263_v0, %v1263_v0  ;;  %v1232_v5 = vmax.f32 %v1168_v1, 0.0  ;;  %v1264_v6 = vmax.f32 %v1200_v2, 0.0 }
 0x16a   : > { %v896_v7 = vpop.f32.mrb[40].mxu0  ;;  %v1024_v8 = vpop.f32.mrb[40].mxu1 }
 0x16b   : > { %1552 = vst.msk [vmem:[%s2349_s21 + $0x48] sm:$0xf] %vm1533_vm0, %v1892_v3  ;;  %1584 = vst.msk [vmem:[%s2349_s21 + $0xc8] sm:$0xf] %vm1533_vm0, %v1924_v4  ;;  %v1893_v9 = vpack.c.bf16 %v1232_v5, %v1232_v5  ;;  %v1925_v10 = vpack.c.bf16 %v1264_v6, %v1264_v6  ;;  %v1098_v11 = vmul.f32 %v2330_v17, %v896_v7  ;;  %v898_v13 = vpop.f32.mrb[41].mxu0  ;;  %v1026_v14 = vpop.f32.mrb[41].mxu1 }
 0x16c   : > { %v1130_v12 = vmul.f32 %v2330_v17, %v1024_v8  ;;  %v899_v15 = vpop.f32.mrb[42].mxu0  ;;  %v1027_v16 = vpop.f32.mrb[42].mxu1 }
 0x16d   : > { %1553 = vst.msk [vmem:[%s2349_s21 + $0x4c] sm:$0xf] %vm1533_vm0, %v1893_v9  ;;  %1585 = vst.msk [vmem:[%s2349_s21 + $0xcc] sm:$0xf] %vm1533_vm0, %v1925_v10  ;;  %v1169_v18 = vadd.f32 %v2335_v19, %v1098_v11  ;;  %v1099_v21 = vmul.f32 %v2330_v17, %v899_v15  ;;  %v1131_v22 = vmul.f32 %v2330_v17, %v1027_v16  ;;  %v901_v23 = vpop.f32.mrb[43].mxu0  ;;  %v1029_v24 = vpop.f32.mrb[43].mxu1 }
 0x16e   : > { %v1201_v20 = vadd.f32 %v2335_v19, %v1130_v12 }
 0x16f   : > { %v1233_v25 = vmax.f32 %v1169_v18, 0.0  ;;  %v1170_v27 = vadd.f32 %v2335_v19, %v1099_v21  ;;  %v1202_v28 = vadd.f32 %v2335_v19, %v1131_v22 }
 0x170   : > { %v1265_v26 = vmax.f32 %v1201_v20, 0.0 }
 0x171   : > { %v1894_v29 = vpack.c.bf16 %v1233_v25, %v1233_v25  ;;  %v1234_v31 = vmax.f32 %v1170_v27, 0.0  ;;  %v1266_v32 = vmax.f32 %v1202_v28, 0.0 }
 0x172   : > { %v1926_v30 = vpack.c.bf16 %v1265_v26, %v1265_v26  ;;  %v904_v33 = vpop.f32.mrb[44].mxu0  ;;  %v1032_v34 = vpop.f32.mrb[44].mxu1 }
 0x173   : > { %1554 = vst.msk [vmem:[%s2349_s21 + $0x50] sm:$0xf] %vm1533_vm0, %v1894_v29  ;;  %v1895_v35 = vpack.c.bf16 %v1234_v31, %v1234_v31  ;;  %v1927_v36 = vpack.c.bf16 %v1266_v32, %v1266_v32  ;;  %v1100_v37 = vmul.f32 %v2330_v17, %v904_v33  ;;  %v1132_v38 = vmul.f32 %v2330_v17, %v1032_v34  ;;  %v906_v39 = vpop.f32.mrb[45].mxu0  ;;  %v1034_v40 = vpop.f32.mrb[45].mxu1 }
 0x174   : > { %1586 = vst.msk [vmem:[%s2349_s21 + $0xd0] sm:$0xf] %vm1533_vm0, %v1926_v30  ;;  %v907_v41 = vpop.f32.mrb[46].mxu0  ;;  %v1035_v42 = vpop.f32.mrb[46].mxu1 }
 0x175   : > { %1555 = vst.msk [vmem:[%s2349_s21 + $0x54] sm:$0xf] %vm1533_vm0, %v1895_v35  ;;  %1587 = vst.msk [vmem:[%s2349_s21 + $0xd4] sm:$0xf] %vm1533_vm0, %v1927_v36  ;;  %v1171_v43 = vadd.f32 %v2335_v19, %v1100_v37  ;;  %v1203_v44 = vadd.f32 %v2335_v19, %v1132_v38  ;;  %v1101_v45 = vmul.f32 %v2330_v17, %v907_v41  ;;  %v909_v47 = vpop.f32.mrb[47].mxu0  ;;  %v1037_v48 = vpop.f32.mrb[47].mxu1 }
 0x176   : > { %v1133_v46 = vmul.f32 %v2330_v17, %v1035_v42 }
 0x177   : > { %v1235_v49 = vmax.f32 %v1171_v43, 0.0  ;;  %v1267_v50 = vmax.f32 %v1203_v44, 0.0  ;;  %v1172_v51 = vadd.f32 %v2335_v19, %v1101_v45 }
 0x178   : > { %v1204_v52 = vadd.f32 %v2335_v19, %v1133_v46 }
 0x179   : > { %v1896_v53 = vpack.c.bf16 %v1235_v49, %v1235_v49  ;;  %v1928_v54 = vpack.c.bf16 %v1267_v50, %v1267_v50  ;;  %v1236_v55 = vmax.f32 %v1172_v51, 0.0 }
 0x17a   : > { %v1268_v56 = vmax.f32 %v1204_v52, 0.0  ;;  %v912_v57 = vpop.f32.mrb[48].mxu0  ;;  %v1040_v58 = vpop.f32.mrb[48].mxu1 }
 0x17b   : > { %1556 = vst.msk [vmem:[%s2349_s21 + $0x58] sm:$0xf] %vm1533_vm0, %v1896_v53  ;;  %1588 = vst.msk [vmem:[%s2349_s21 + $0xd8] sm:$0xf] %vm1533_vm0, %v1928_v54  ;;  %v1897_v59 = vpack.c.bf16 %v1236_v55, %v1236_v55  ;;  %v1102_v61 = vmul.f32 %v2330_v17, %v912_v57  ;;  %v1134_v62 = vmul.f32 %v2330_v17, %v1040_v58  ;;  %v914_v63 = vpop.f32.mrb[49].mxu0  ;;  %v1042_v0 = vpop.f32.mrb[49].mxu1 }
 0x17c   : > { %v1929_v60 = vpack.c.bf16 %v1268_v56, %v1268_v56  ;;  %v915_v1 = vpop.f32.mrb[50].mxu0  ;;  %v1043_v2 = vpop.f32.mrb[50].mxu1 }
 0x17d   : > { %1557 = vst.msk [vmem:[%s2349_s21 + $0x5c] sm:$0xf] %vm1533_vm0, %v1897_v59  ;;  %v1173_v3 = vadd.f32 %v2335_v19, %v1102_v61  ;;  %v1205_v4 = vadd.f32 %v2335_v19, %v1134_v62  ;;  %v1103_v5 = vmul.f32 %v2330_v17, %v915_v1  ;;  %v1135_v6 = vmul.f32 %v2330_v17, %v1043_v2  ;;  %v917_v7 = vpop.f32.mrb[51].mxu0  ;;  %v1045_v8 = vpop.f32.mrb[51].mxu1 }
 0x17e   : > { %1589 = vst.msk [vmem:[%s2349_s21 + $0xdc] sm:$0xf] %vm1533_vm0, %v1929_v60 }
 0x17f   : > { %v1237_v9 = vmax.f32 %v1173_v3, 0.0  ;;  %v1269_v10 = vmax.f32 %v1205_v4, 0.0  ;;  %v1174_v11 = vadd.f32 %v2335_v19, %v1103_v5  ;;  %v1206_v12 = vadd.f32 %v2335_v19, %v1135_v6 }
 0x181   : > { %v1898_v13 = vpack.c.bf16 %v1237_v9, %v1237_v9  ;;  %v1930_v14 = vpack.c.bf16 %v1269_v10, %v1269_v10  ;;  %v1238_v15 = vmax.f32 %v1174_v11, 0.0  ;;  %v1270_v16 = vmax.f32 %v1206_v12, 0.0 }
 0x182   : > { %v920_v18 = vpop.f32.mrb[52].mxu0  ;;  %v1048_v20 = vpop.f32.mrb[52].mxu1 }
 0x183   : > { %1558 = vst.msk [vmem:[%s2349_s21 + $0x60] sm:$0xf] %vm1533_vm0, %v1898_v13  ;;  %1590 = vst.msk [vmem:[%s2349_s21 + $0xe0] sm:$0xf] %vm1533_vm0, %v1930_v14  ;;  %v1899_v21 = vpack.c.bf16 %v1238_v15, %v1238_v15  ;;  %v1931_v22 = vpack.c.bf16 %v1270_v16, %v1270_v16  ;;  %v1104_v23 = vmul.f32 %v2330_v17, %v920_v18  ;;  %v922_v25 = vpop.f32.mrb[53].mxu0  ;;  %v1050_v26 = vpop.f32.mrb[53].mxu1 }
 0x184   : > { %v1136_v24 = vmul.f32 %v2330_v17, %v1048_v20  ;;  %v923_v27 = vpop.f32.mrb[54].mxu0  ;;  %v1051_v28 = vpop.f32.mrb[54].mxu1 }
 0x185   : > { %1559 = vst.msk [vmem:[%s2349_s21 + $0x64] sm:$0xf] %vm1533_vm0, %v1899_v21  ;;  %1591 = vst.msk [vmem:[%s2349_s21 + $0xe4] sm:$0xf] %vm1533_vm0, %v1931_v22  ;;  %v1175_v29 = vadd.f32 %v2335_v19, %v1104_v23  ;;  %v1105_v31 = vmul.f32 %v2330_v17, %v923_v27  ;;  %v1137_v32 = vmul.f32 %v2330_v17, %v1051_v28  ;;  %v925_v33 = vpop.f32.mrb[55].mxu0  ;;  %v1053_v34 = vpop.f32.mrb[55].mxu1 }
 0x186   : > { %v1207_v30 = vadd.f32 %v2335_v19, %v1136_v24 }
 0x187   : > { %v1239_v35 = vmax.f32 %v1175_v29, 0.0  ;;  %v1176_v37 = vadd.f32 %v2335_v19, %v1105_v31  ;;  %v1208_v38 = vadd.f32 %v2335_v19, %v1137_v32 }
 0x188   : > { %v1271_v36 = vmax.f32 %v1207_v30, 0.0 }
 0x189   : > { %v1900_v39 = vpack.c.bf16 %v1239_v35, %v1239_v35  ;;  %v1240_v41 = vmax.f32 %v1176_v37, 0.0  ;;  %v1272_v42 = vmax.f32 %v1208_v38, 0.0 }
 0x18a   : > { %v1932_v40 = vpack.c.bf16 %v1271_v36, %v1271_v36  ;;  %v928_v43 = vpop.f32.mrb[56].mxu0  ;;  %v1056_v44 = vpop.f32.mrb[56].mxu1 }
 0x18b   : > { %1560 = vst.msk [vmem:[%s2349_s21 + $0x68] sm:$0xf] %vm1533_vm0, %v1900_v39  ;;  %v1901_v45 = vpack.c.bf16 %v1240_v41, %v1240_v41  ;;  %v1933_v46 = vpack.c.bf16 %v1272_v42, %v1272_v42  ;;  %v1106_v47 = vmul.f32 %v2330_v17, %v928_v43  ;;  %v1138_v48 = vmul.f32 %v2330_v17, %v1056_v44  ;;  %v930_v49 = vpop.f32.mrb[57].mxu0  ;;  %v1058_v50 = vpop.f32.mrb[57].mxu1 }
 0x18c   : > { %1592 = vst.msk [vmem:[%s2349_s21 + $0xe8] sm:$0xf] %vm1533_vm0, %v1932_v40  ;;  %v931_v51 = vpop.f32.mrb[58].mxu0  ;;  %v1059_v52 = vpop.f32.mrb[58].mxu1 }
 0x18d   : > { %1561 = vst.msk [vmem:[%s2349_s21 + $0x6c] sm:$0xf] %vm1533_vm0, %v1901_v45  ;;  %1593 = vst.msk [vmem:[%s2349_s21 + $0xec] sm:$0xf] %vm1533_vm0, %v1933_v46  ;;  %v1177_v53 = vadd.f32 %v2335_v19, %v1106_v47  ;;  %v1209_v54 = vadd.f32 %v2335_v19, %v1138_v48  ;;  %v1107_v55 = vmul.f32 %v2330_v17, %v931_v51  ;;  %v933_v57 = vpop.f32.mrb[59].mxu0  ;;  %v1061_v58 = vpop.f32.mrb[59].mxu1 }
 0x18e   : > { %v1139_v56 = vmul.f32 %v2330_v17, %v1059_v52 }
 0x18f   : > { %v1241_v59 = vmax.f32 %v1177_v53, 0.0  ;;  %v1273_v60 = vmax.f32 %v1209_v54, 0.0  ;;  %v1178_v61 = vadd.f32 %v2335_v19, %v1107_v55 }
 0x190   : > { %v1210_v62 = vadd.f32 %v2335_v19, %v1139_v56 }
 0x191   : > { %v1902_v63 = vpack.c.bf16 %v1241_v59, %v1241_v59  ;;  %v1934_v0 = vpack.c.bf16 %v1273_v60, %v1273_v60  ;;  %v1242_v1 = vmax.f32 %v1178_v61, 0.0 }
 0x192   : > { %v1274_v2 = vmax.f32 %v1210_v62, 0.0  ;;  %v936_v3 = vpop.f32.mrb[60].mxu0  ;;  %v1064_v4 = vpop.f32.mrb[60].mxu1 }
 0x193   : > { %1562 = vst.msk [vmem:[%s2349_s21 + $0x70] sm:$0xf] %vm1533_vm0, %v1902_v63  ;;  %1594 = vst.msk [vmem:[%s2349_s21 + $0xf0] sm:$0xf] %vm1533_vm0, %v1934_v0  ;;  %v1903_v5 = vpack.c.bf16 %v1242_v1, %v1242_v1  ;;  %v1108_v7 = vmul.f32 %v2330_v17, %v936_v3  ;;  %v1140_v8 = vmul.f32 %v2330_v17, %v1064_v4  ;;  %v938_v9 = vpop.f32.mrb[61].mxu0  ;;  %v1066_v10 = vpop.f32.mrb[61].mxu1 }
 0x194   : > { %v1935_v6 = vpack.c.bf16 %v1274_v2, %v1274_v2  ;;  %v939_v11 = vpop.f32.mrb[62].mxu0  ;;  %v1067_v12 = vpop.f32.mrb[62].mxu1 }
 0x195   : > { %1563 = vst.msk [vmem:[%s2349_s21 + $0x74] sm:$0xf] %vm1533_vm0, %v1903_v5  ;;  %v1179_v13 = vadd.f32 %v2335_v19, %v1108_v7  ;;  %v1211_v14 = vadd.f32 %v2335_v19, %v1140_v8  ;;  %v1109_v15 = vmul.f32 %v2330_v17, %v939_v11  ;;  %v1141_v16 = vmul.f32 %v2330_v17, %v1067_v12  ;;  %v941_v18 = vpop.f32.mrb[63].mxu0  ;;  %v1069_v20 = vpop.f32.mrb[63].mxu1 }
 0x196   : > { %1595 = vst.msk [vmem:[%s2349_s21 + $0xf4] sm:$0xf] %vm1533_vm0, %v1935_v6 }
 0x197   : > { %v1243_v21 = vmax.f32 %v1179_v13, 0.0  ;;  %v1275_v22 = vmax.f32 %v1211_v14, 0.0  ;;  %v1180_v23 = vadd.f32 %v2335_v19, %v1109_v15  ;;  %v1212_v24 = vadd.f32 %v2335_v19, %v1141_v16 }
 0x199   : > { %v1904_v25 = vpack.c.bf16 %v1243_v21, %v1243_v21  ;;  %v1936_v26 = vpack.c.bf16 %v1275_v22, %v1275_v22  ;;  %v1244_v27 = vmax.f32 %v1180_v23, 0.0  ;;  %v1276_v28 = vmax.f32 %v1212_v24, 0.0 }
 0x19b   : > { %1564 = vst.msk [vmem:[%s2349_s21 + $0x78] sm:$0xf] %vm1533_vm0, %v1904_v25  ;;  %1596 = vst.msk [vmem:[%s2349_s21 + $0xf8] sm:$0xf] %vm1533_vm0, %v1936_v26  ;;  %v1905_v29 = vpack.c.bf16 %v1244_v27, %v1244_v27  ;;  %v1937_v30 = vpack.c.bf16 %v1276_v28, %v1276_v28 }
 0x19d   : > { %1565 = vst.msk [vmem:[%s2349_s21 + $0x7c] sm:$0xf] %vm1533_vm0, %v1905_v29  ;;  %1597 = vst.msk [vmem:[%s2349_s21 + $0xfc] sm:$0xf] %vm1533_vm0, %v1937_v30 }
 0x19e PF: > { %s14_s17 = sadd.s32 1, %s2129_s17   ;;  %s2613_s15 = smov %s2125_s16 }
 0x19f   : > { %p11_p5 = scmp.ge.s32.totalorder %s14_s17, 6   ;;  %s2614_s16 = smov %s2616_s18 }
 0x1a1   :  { %13 = sbr.rel (!%p11_p5) target bundleno = 2 (0x2), region = 75 }

</bundles_post_ra>
